<compile_context>
chip_gen: v7x
topology: tpu7x:2x2x1
jax: 0.10.0
libtpu: 0.0.40
codegen_flags: <defaults>
</compile_context>

<pallas_src>
import math
import numpy as np
import jax
import jax.numpy as jnp
from jax.experimental import pallas as pl
from jax.experimental.pallas import tpu as pltpu

# ----------------------------- configuration ---------------------------------
# Conv2d_kernel=[(4,4),(1,1)], strides=[4,1], paddings=[0,0], SFM_filters=[(2,2)]
# channels=[[30,64],[20,32]], conv_method='cdist',
# rbfs=[[['gauss','cReLU'],['gauss']],[['gauss','cReLU'],['gauss']]]
C_RGB1, C_RGB2   = 30, 64
C_GRAY1, C_GRAY2 = 20, 32
STD_RGB1, STD_RGB2   = 0.3, 1.0
STD_GRAY1, STD_GRAY2 = 0.6, 1.2
CRELU_BIAS   = 0.7                        # cReLU() default bias in the reference
OUT_CLASSES  = 10
FC_INPUT     = C_RGB2 * 4 + C_GRAY2 * 4   # 64*2*2 + 32*2*2 = 384
LARGE        = 1e12                       # additive pre-exp mask for padded lanes
# TODO(synk): cReLU_percent (per-pixel top-k across channels) is not used in this
# configuration and has no clean Pallas equivalent here.

# Packed constant-table row layout (single resident input).
ROW_PAL   = 0                 # rows 0..2 : palette R,G,B * 255 (lanes < 30)
ROW_RGBM  = 3                 # row  3    : +LARGE mask for lanes >= 30 (RGB branch)
ROW_G1SQ  = 4                 # row  4    : ||w^2||^2 gray layer-1 (+LARGE mask)
ROW_R2SQ  = 5                 # row  5    : ||w^2||^2 rgb  layer-2
ROW_G2SQ  = 6                 # row  6    : ||w^2||^2 gray layer-2
ROW_FCB   = 7                 # row  7    : FC bias (lanes < 10)
ROW_WG1T  = 8                 # 128 rows  : gray layer-1 (w^2)^T at K-rows 16..31
ROW_WR2T  = ROW_WG1T + 128    # 128 rows  : rgb  layer-2 (w^2)^T
ROW_WG2T  = ROW_WR2T + 128    # 128 rows  : gray layer-2 (w^2)^T
ROW_FCW   = ROW_WG2T + 128    # 1024 rows : FC weight, 8 per-position 128-row blocks
TBL_ROWS  = ROW_FCW + 8 * 128 # 1416

GRAY_LANE = 16                # gray 4x4 patch lives in lanes 16..31 of a feature row
XSQ_LANE  = 3                 # precomputed gray ||x||^2 lives in lane 3

ALPHA = np.linspace(0.99, 0.9, 4, dtype=np.float32)   # SFM alpha, index = dh*2 + dw

PALETTE = np.array(
    [[255, 255, 255], [219, 178, 187], [210, 144, 98], [230, 79, 56], [207, 62, 108],
     [130, 44, 28], [91, 31, 58], [209, 215, 63], [194, 202, 119], [224, 148, 36],
     [105, 147, 29], [131, 104, 50], [115, 233, 72], [189, 211, 189], [109, 215, 133],
     [72, 131, 77], [69, 81, 65], [77, 212, 193], [101, 159, 190], [120, 142, 215],
     [121, 102, 215], [111, 42, 240], [75, 42, 185], [57, 41, 119], [42, 46, 71],
     [216, 129, 199], [214, 67, 205], [147, 107, 128], [136, 48, 133], [0, 0, 0]],
    dtype=np.float32) / 255.0


# ----------------------------- fused Pallas kernel ----------------------------
def make_kernel(TB):
    """TB = images per grid step (multiple of 8)."""
    inv_rgb1  = -1.0 / (2.0 * STD_RGB1 * STD_RGB1 * 765.0 * 765.0)  # gauss(sqrt(lab2)/765)
    inv_gray1 = -1.0 / (2.0 * STD_GRAY1 * STD_GRAY1)
    inv_rgb2  = -1.0 / (2.0 * STD_RGB2 * STD_RGB2)
    inv_gray2 = -1.0 / (2.0 * STD_GRAY2 * STD_GRAY2)
    a_pool = [float(a) * 0.25 for a in ALPHA]          # alpha * mean(1/4)
    FTB = 4 * TB                                       # rows per (dh,dw) block

    def kernel(feat_ref, tbl_ref, out_ref):
        f32 = jnp.float32
        feat = feat_ref[...]                           # (16*TB, 128)

        # ---- layer 1, RGB branch: LAB colour distance /765 -> gauss -> cReLU ----
        pal = tbl_ref[ROW_PAL:ROW_PAL + 3, :]          # rows = palette R,G,B * 255
        R1, G1, B1 = feat[:, 0:1], feat[:, 1:2], feat[:, 2:3]
        R2, G2, B2 = pal[0:1, :], pal[1:2, :], pal[2:3, :]
        rmean = (R1 + R2) * 0.5
        dR, dG, dB = R1 - R2, G1 - G2, B1 - B2
        lab2 = ((2.0 + rmean * (1.0 / 256.0)) * dR * dR
                + 4.0 * dG * dG
                + (2.0 + (255.0 - rmean) * (1.0 / 256.0)) * dB * dB + 1e-8)
        # +LARGE on padded lanes (>=30): exp underflows to exactly 0 (no select).
        lab2 = lab2 + tbl_ref[ROW_RGBM:ROW_RGBM + 1, :]
        a = jnp.exp(lab2 * inv_rgb1)                   # sqrt folded into the square
        rgb1 = jnp.where(a >= CRELU_BIAS, a, 0.0)      # cReLU, fixed bias 0.7

        # ---- layer 1, Gray branch: cdist(win, w**2) -> gauss -> cReLU ----
        # Gray patch occupies lanes 16..31; weight rows 16..31 are the only nonzero K.
        cross = jnp.dot(feat, tbl_ref[ROW_WG1T:ROW_WG1T + 128, :],
                        preferred_element_type=f32)
        d2 = jnp.maximum(feat[:, XSQ_LANE:XSQ_LANE + 1]             # precomputed ||x||^2
                         + tbl_ref[ROW_G1SQ:ROW_G1SQ + 1, :]        # ||w^2||^2 + LARGE mask
                         - 2.0 * cross, 0.0)
        a = jnp.exp(d2 * inv_gray1)
        gray1 = jnp.where(a >= CRELU_BIAS, a, 0.0)

        # ---- SFM (alpha-weighted 2x2 mean): 4 static row-slice FMAs, no P matrix ----
        rgb_p = (a_pool[0] * rgb1[0:FTB]          + a_pool[1] * rgb1[FTB:2 * FTB]
                 + a_pool[2] * rgb1[2 * FTB:3 * FTB] + a_pool[3] * rgb1[3 * FTB:4 * FTB])
        gray_p = (a_pool[0] * gray1[0:FTB]          + a_pool[1] * gray1[FTB:2 * FTB]
                  + a_pool[2] * gray1[2 * FTB:3 * FTB] + a_pool[3] * gray1[3 * FTB:4 * FTB])
        # rows of rgb_p/gray_p are ordered (spatial p, image b) -> p*TB + b.

        # ---- layer 2: 1x1 cdist(x, w**2) -> gauss (no lane mask needed: the
        #      padded FC-weight rows are zero, so stray lanes never reach the output) ----
        def cdist_gauss(xp, wrow, sqrow, inv):
            cr = jnp.dot(xp, tbl_ref[wrow:wrow + 128, :], preferred_element_type=f32)
            xs = jnp.sum(xp * xp, axis=-1, keepdims=True)
            dd = jnp.maximum(xs + tbl_ref[sqrow:sqrow + 1, :] - 2.0 * cr, 0.0)
            return jnp.exp(dd * inv)

        rgb2  = cdist_gauss(rgb_p,  ROW_WR2T, ROW_R2SQ, inv_rgb2)   # (4*TB, 128)
        gray2 = cdist_gauss(gray_p, ROW_WG2T, ROW_G2SQ, inv_gray2)

        # ---- FC: (C,H,W)-flatten folded into the weight layout; one fused matmul ----
        parts = ([rgb2[p * TB:(p + 1) * TB] for p in range(4)]
                 + [gray2[p * TB:(p + 1) * TB] for p in range(4)])
        xcat = jnp.concatenate(parts, axis=-1)                       # (TB, 1024)
        logits = jnp.dot(xcat, tbl_ref[ROW_FCW:ROW_FCW + 8 * 128, :],
                         preferred_element_type=f32)
        out_ref[...] = logits + tbl_ref[ROW_FCB:ROW_FCB + 1, :]

    return kernel


# ----------------------------- forward (batch-tiled pallas_call) --------------
@jax.jit
def rgb_sfmcnn_v2_forward(x, params):
    """x: (B, 3, 16, 16) float32 RGB in [0,1]  ->  logits (B, 10)."""
    B = x.shape[0]
    assert x.shape[1:] == (3, 16, 16)
    GP8 = ((B + 7) // 8) * 8
    TB = min(64, GP8)                       # images per grid step (multiple of 8)
    GP = ((B + TB - 1) // TB) * TB          # padded batch, multiple of TB
    nt = GP // TB                           # grid steps

    f32 = jnp.float32

    # --- reshape-only unfold (4x4 kernel, stride 4, no padding): no gather ---
    # Row order (tile t, dh, dw, ho, wo, image b) so the SFM pool is 4 static
    # row-slice FMAs inside the kernel and each grid step owns 16*TB rows.
    xr = x.reshape(B, 3, 2, 2, 4, 2, 2, 4)                  # (B,C,ho,dh,ph,wo,dw,pw)
    rgb_mean = xr.mean(axis=(4, 7))                          # (B,C,ho,dh,wo,dw)
    rgb_mean = rgb_mean.transpose(3, 5, 2, 4, 0, 1) * 255.0  # (dh,dw,ho,wo,B,C=3)

    # --- grayscale + per-image renormalize (Renormalize), folded into the prep ---
    gimg = 0.2989 * x[:, 0] + 0.587 * x[:, 1] + 0.114 * x[:, 2]       # (B,16,16)
    gflat = gimg.reshape(B, 256)
    mn = gflat.min(axis=-1, keepdims=True)
    mx = gflat.max(axis=-1, keepdims=True)
    rng = mx - mn
    gnorm = jnp.where(rng == 0.0, 0.0,
                      (gflat - mn) / jnp.where(rng == 0.0, 1.0, rng))
    gr = gnorm.reshape(B, 2, 2, 4, 2, 2, 4)                  # (B,ho,dh,ph,wo,dw,pw)
    gr = gr.transpose(2, 5, 1, 4, 0, 3, 6)                   # (dh,dw,ho,wo,B,ph,pw)
    gwin = gr.reshape(2, 2, 2, 2, B, 16)                     # unfold order (ph,pw)
    gxsq = jnp.sum(gwin * gwin, axis=-1, keepdims=True)      # precompute ||x||^2

    # --- single compact feature stream: lanes 0-2 rgb means, 3 gray ||x||^2,
    #     16-31 gray patch, rest zero ---
    z12 = jnp.zeros((2, 2, 2, 2, B, GRAY_LANE - 4), f32)
    z96 = jnp.zeros((2, 2, 2, 2, B, 128 - GRAY_LANE - 16), f32)
    feat = jnp.concatenate([rgb_mean, gxsq, z12, gwin, z96], axis=-1)  # (2,2,2,2,B,128)
    feat = jnp.pad(feat, ((0, 0),) * 4 + ((0, GP - B), (0, 0)))
    feat = (feat.reshape(2, 2, 2, 2, nt, TB, 128)
                .transpose(4, 0, 1, 2, 3, 5, 6)
                .reshape(GP * 16, 128))

    out = pl.pallas_call(
        make_kernel(TB),
        grid=(nt,),
        in_specs=[
            pl.BlockSpec((16 * TB, 128), lambda i: (i, 0)),        # per-tile features
            pl.BlockSpec((TBL_ROWS, 128), lambda i: (0, 0)),       # resident constants
        ],
        out_specs=pl.BlockSpec((TB, 128), lambda i: (i, 0)),
        out_shape=jax.ShapeDtypeStruct((GP, 128), jnp.float32),
        compiler_params=pltpu.CompilerParams(
            dimension_semantics=("parallel",),                     # v7x megacore sharding
            vmem_limit_bytes=32 * 1024 * 1024),
    )(feat, params['tbl'])
    return out[:B, :OUT_CLASSES]


# ----------------------------- parameter init (kernel-ready packed table) -----
def init_params(key):
    k1, k2, k3, k4, k5 = jax.random.split(key, 5)
    f32 = jnp.float32

    def kaiming_uniform(k, shape):
        bound = math.sqrt(6.0 / shape[1])
        return jax.random.uniform(k, shape, f32, -bound, bound)

    w_gray1 = kaiming_uniform(k1, (C_GRAY1, 16))            # Gray_Conv2d  (20, 1*4*4)
    w_rgb2  = kaiming_uniform(k2, (C_RGB2, C_RGB1))         # RBF_Conv2d   (64, 30)
    w_gray2 = kaiming_uniform(k3, (C_GRAY2, C_GRAY1))       # RBF_Conv2d   (32, 20)
    fb = 1.0 / math.sqrt(FC_INPUT)
    fc_w = jax.random.uniform(k4, (OUT_CLASSES, FC_INPUT), f32, -fb, fb)
    fc_b = jax.random.uniform(k5, (OUT_CLASSES,), f32, -fb, fb)

    lane = jnp.arange(128)
    tbl = jnp.zeros((TBL_ROWS, 128), f32)

    # Palette rows (R,G,B)*255 and the additive lane mask for the LAB branch.
    tbl = tbl.at[ROW_PAL:ROW_PAL + 3, :C_RGB1].set(jnp.asarray(PALETTE.T) * 255.0)
    tbl = tbl.at[ROW_RGBM].set(jnp.where(lane < C_RGB1, 0.0, LARGE))

    # cdist is computed against the SQUARED weight (as in the reference):
    #   d^2 = ||x||^2 + ||w^2||^2 - 2 x.(w^2)
    def sq_row(w, C, add_mask):
        wsq = w.astype(f32) ** 2
        row = jnp.zeros((128,), f32).at[:C].set(jnp.sum(wsq * wsq, axis=-1))
        if add_mask:                                   # fold padded-lane mask pre-exp
            row = row + jnp.where(lane < C, 0.0, LARGE)
        return row

    tbl = tbl.at[ROW_G1SQ].set(sq_row(w_gray1, C_GRAY1, True))
    tbl = tbl.at[ROW_R2SQ].set(sq_row(w_rgb2, C_RGB2, False))
    tbl = tbl.at[ROW_G2SQ].set(sq_row(w_gray2, C_GRAY2, False))
    tbl = tbl.at[ROW_FCB, :OUT_CLASSES].set(fc_b)

    # Transposed squared weights. Gray layer-1 K-rows sit at 16..31 to match the
    # gray-patch lanes of the feature row (so the kernel needs no lane slicing).
    tbl = tbl.at[ROW_WG1T + GRAY_LANE:ROW_WG1T + GRAY_LANE + 16, :C_GRAY1].set(
        (w_gray1.astype(f32) ** 2).T)
    tbl = tbl.at[ROW_WR2T:ROW_WR2T + C_RGB1, :C_RGB2].set((w_rgb2.astype(f32) ** 2).T)
    tbl = tbl.at[ROW_WG2T:ROW_WG2T + C_GRAY1, :C_GRAY2].set((w_gray2.astype(f32) ** 2).T)

    # FC weight re-laid-out as 8 per-position (128ch, 128out) blocks:
    #   torch flatten per image is (channel, h, w) -> rgb feature f = c*4 + p,
    #   gray feature f = 256 + c*4 + p.  Block order matches the in-kernel concat.
    wr = fc_w[:, :C_RGB2 * 4].reshape(OUT_CLASSES, C_RGB2, 4).transpose(2, 1, 0)   # (4,64,10)
    fcr = jnp.zeros((4, 128, 128), f32).at[:, :C_RGB2, :OUT_CLASSES].set(wr)
    wg = fc_w[:, C_RGB2 * 4:].reshape(OUT_CLASSES, C_GRAY2, 4).transpose(2, 1, 0)  # (4,32,10)
    fcg = jnp.zeros((4, 128, 128), f32).at[:, :C_GRAY2, :OUT_CLASSES].set(wg)
    fcw = jnp.concatenate([fcr, fcg], axis=0).reshape(8 * 128, 128)
    tbl = tbl.at[ROW_FCW:ROW_FCW + 8 * 128].set(fcw)

    return dict(tbl=tbl)


if __name__ == "__main__":
    key = jax.random.PRNGKey(0)
    kp, kx = jax.random.split(key)
    params = init_params(kp)
    x = jax.random.uniform(kx, (2, 3, 16, 16), jnp.float32)   # NCHW RGB image in [0,1]
    out = rgb_sfmcnn_v2_forward(x, params)
    out = jax.block_until_ready(out)
    assert out.shape == (2, OUT_CLASSES)
    assert bool(jnp.all(jnp.isfinite(out)))
    print("KERNEL_OK")
</pallas_src>

<mosaic_0001>
module attributes {stable_mosaic.version = 11 : i64} {
  func.func @kernel(%arg0: i32, %arg1: memref<128x128xf32, #tpu.memory_space<vmem>>, %arg2: memref<1416x128xf32, #tpu.memory_space<vmem>>, %arg3: memref<8x128xf32, #tpu.memory_space<vmem>>) attributes {dimension_semantics = [#tpu.dimension_semantics<parallel>], iteration_bounds = array<i64: 1>, scalar_prefetch = 0 : i64, scratch_operands = 0 : i64, tpu.core_type = #tpu.core_type<tc>, window_params = [{transform_indices = @transform_0, window_bounds = array<i64: 128, 128>}, {pipeline_mode = #tpu.pipeline_mode<synchronous>, transform_indices = @transform_1, window_bounds = array<i64: 1416, 128>}, {transform_indices = @transform_2, window_bounds = array<i64: 8, 128>}]} {
    %c0 = arith.constant 0 : index
    %c0_0 = arith.constant 0 : index
    %0 = vector.load %arg1[%c0, %c0_0] : memref<128x128xf32, #tpu.memory_space<vmem>>, vector<128x128xf32>
    %c0_1 = arith.constant 0 : index
    %c0_2 = arith.constant 0 : index
    %1 = vector.load %arg2[%c0_1, %c0_2] : memref<1416x128xf32, #tpu.memory_space<vmem>>, vector<3x128xf32>
    %2 = vector.extract_strided_slice %0 {offsets = [0, 0], sizes = [128, 1], strides = [1, 1]} : vector<128x128xf32> to vector<128x1xf32>
    %3 = vector.extract_strided_slice %0 {offsets = [0, 1], sizes = [128, 1], strides = [1, 1]} : vector<128x128xf32> to vector<128x1xf32>
    %4 = vector.extract_strided_slice %0 {offsets = [0, 2], sizes = [128, 1], strides = [1, 1]} : vector<128x128xf32> to vector<128x1xf32>
    %5 = vector.extract_strided_slice %1 {offsets = [0, 0], sizes = [1, 128], strides = [1, 1]} : vector<3x128xf32> to vector<1x128xf32>
    %6 = vector.extract_strided_slice %1 {offsets = [1, 0], sizes = [1, 128], strides = [1, 1]} : vector<3x128xf32> to vector<1x128xf32>
    %7 = vector.extract_strided_slice %1 {offsets = [2, 0], sizes = [1, 128], strides = [1, 1]} : vector<3x128xf32> to vector<1x128xf32>
    %8 = vector.broadcast %2 : vector<128x1xf32> to vector<128x128xf32>
    %9 = vector.broadcast %5 : vector<1x128xf32> to vector<128x128xf32>
    %10 = arith.addf %8, %9 : vector<128x128xf32>
    %cst = arith.constant 5.000000e-01 : f32
    %11 = vector.broadcast %cst : f32 to vector<128x128xf32>
    %12 = arith.mulf %10, %11 : vector<128x128xf32>
    %13 = vector.broadcast %2 : vector<128x1xf32> to vector<128x128xf32>
    %14 = vector.broadcast %5 : vector<1x128xf32> to vector<128x128xf32>
    %15 = arith.subf %13, %14 : vector<128x128xf32>
    %16 = vector.broadcast %3 : vector<128x1xf32> to vector<128x128xf32>
    %17 = vector.broadcast %6 : vector<1x128xf32> to vector<128x128xf32>
    %18 = arith.subf %16, %17 : vector<128x128xf32>
    %19 = vector.broadcast %4 : vector<128x1xf32> to vector<128x128xf32>
    %20 = vector.broadcast %7 : vector<1x128xf32> to vector<128x128xf32>
    %21 = arith.subf %19, %20 : vector<128x128xf32>
    %cst_3 = arith.constant 3.906250e-03 : f32
    %22 = vector.broadcast %cst_3 : f32 to vector<128x128xf32>
    %23 = arith.mulf %12, %22 : vector<128x128xf32>
    %cst_4 = arith.constant 2.000000e+00 : f32
    %24 = vector.broadcast %cst_4 : f32 to vector<128x128xf32>
    %25 = arith.addf %24, %23 : vector<128x128xf32>
    %26 = arith.mulf %25, %15 : vector<128x128xf32>
    %27 = arith.mulf %26, %15 : vector<128x128xf32>
    %cst_5 = arith.constant 4.000000e+00 : f32
    %28 = vector.broadcast %cst_5 : f32 to vector<128x128xf32>
    %29 = arith.mulf %28, %18 : vector<128x128xf32>
    %30 = arith.mulf %29, %18 : vector<128x128xf32>
    %31 = arith.addf %27, %30 : vector<128x128xf32>
    %cst_6 = arith.constant 2.550000e+02 : f32
    %32 = vector.broadcast %cst_6 : f32 to vector<128x128xf32>
    %33 = arith.subf %32, %12 : vector<128x128xf32>
    %cst_7 = arith.constant 3.906250e-03 : f32
    %34 = vector.broadcast %cst_7 : f32 to vector<128x128xf32>
    %35 = arith.mulf %33, %34 : vector<128x128xf32>
    %cst_8 = arith.constant 2.000000e+00 : f32
    %36 = vector.broadcast %cst_8 : f32 to vector<128x128xf32>
    %37 = arith.addf %36, %35 : vector<128x128xf32>
    %38 = arith.mulf %37, %21 : vector<128x128xf32>
    %39 = arith.mulf %38, %21 : vector<128x128xf32>
    %40 = arith.addf %31, %39 : vector<128x128xf32>
    %cst_9 = arith.constant 9.99999993E-9 : f32
    %41 = vector.broadcast %cst_9 : f32 to vector<128x128xf32>
    %42 = arith.addf %40, %41 : vector<128x128xf32>
    %c3 = arith.constant 3 : index
    %c0_10 = arith.constant 0 : index
    %43 = vector.load %arg2[%c3, %c0_10] : memref<1416x128xf32, #tpu.memory_space<vmem>>, vector<1x128xf32>
    %44 = vector.broadcast %43 : vector<1x128xf32> to vector<128x128xf32>
    %45 = arith.addf %42, %44 : vector<128x128xf32>
    %cst_11 = arith.constant -9.49302466E-6 : f32
    %46 = vector.broadcast %cst_11 : f32 to vector<128x128xf32>
    %47 = arith.mulf %45, %46 : vector<128x128xf32>
    %48 = math.exp %47 : vector<128x128xf32>
    %cst_12 = arith.constant 0.699999988 : f32
    %49 = vector.broadcast %cst_12 : f32 to vector<128x128xf32>
    %50 = arith.cmpf oge, %48, %49 : vector<128x128xf32>
    %cst_13 = arith.constant 0.000000e+00 : f32
    %51 = vector.broadcast %cst_13 : f32 to vector<128x128xf32>
    %52 = arith.select %50, %48, %51 : vector<128x128xi1>, vector<128x128xf32>
    %c8 = arith.constant 8 : index
    %c0_14 = arith.constant 0 : index
    %53 = vector.load %arg2[%c8, %c0_14] : memref<1416x128xf32, #tpu.memory_space<vmem>>, vector<128x128xf32>
    %cst_15 = arith.constant dense<0.000000e+00> : vector<128x128xf32>
    %54 = tpu.matmul %0, %53, %cst_15 {dimension_numbers = #tpu.dot_dimension_numbers<[1], [0], [0], [1], [0, 0, 1, 1], [], []>} : vector<128x128xf32>, vector<128x128xf32>, vector<128x128xf32> -> vector<128x128xf32>
    %55 = vector.extract_strided_slice %0 {offsets = [0, 3], sizes = [128, 1], strides = [1, 1]} : vector<128x128xf32> to vector<128x1xf32>
    %c4 = arith.constant 4 : index
    %c0_16 = arith.constant 0 : index
    %56 = vector.load %arg2[%c4, %c0_16] : memref<1416x128xf32, #tpu.memory_space<vmem>>, vector<1x128xf32>
    %57 = vector.broadcast %55 : vector<128x1xf32> to vector<128x128xf32>
    %58 = vector.broadcast %56 : vector<1x128xf32> to vector<128x128xf32>
    %59 = arith.addf %57, %58 : vector<128x128xf32>
    %cst_17 = arith.constant 2.000000e+00 : f32
    %60 = vector.broadcast %cst_17 : f32 to vector<128x128xf32>
    %61 = arith.mulf %60, %54 : vector<128x128xf32>
    %62 = arith.subf %59, %61 : vector<128x128xf32>
    %cst_18 = arith.constant 0.000000e+00 : f32
    %63 = vector.broadcast %cst_18 : f32 to vector<128x128xf32>
    %64 = arith.maximumf %62, %63 : vector<128x128xf32>
    %cst_19 = arith.constant -1.38888884 : f32
    %65 = vector.broadcast %cst_19 : f32 to vector<128x128xf32>
    %66 = arith.mulf %64, %65 : vector<128x128xf32>
    %67 = math.exp %66 : vector<128x128xf32>
    %cst_20 = arith.constant 0.699999988 : f32
    %68 = vector.broadcast %cst_20 : f32 to vector<128x128xf32>
    %69 = arith.cmpf oge, %67, %68 : vector<128x128xf32>
    %cst_21 = arith.constant 0.000000e+00 : f32
    %70 = vector.broadcast %cst_21 : f32 to vector<128x128xf32>
    %71 = arith.select %69, %67, %70 : vector<128x128xi1>, vector<128x128xf32>
    %72 = vector.extract_strided_slice %52 {offsets = [0, 0], sizes = [32, 128], strides = [1, 1]} : vector<128x128xf32> to vector<32x128xf32>
    %cst_22 = arith.constant 2.475000e-01 : f32
    %73 = vector.broadcast %cst_22 : f32 to vector<32x128xf32>
    %74 = arith.mulf %73, %72 : vector<32x128xf32>
    %75 = vector.extract_strided_slice %52 {offsets = [32, 0], sizes = [32, 128], strides = [1, 1]} : vector<128x128xf32> to vector<32x128xf32>
    %cst_23 = arith.constant 2.400000e-01 : f32
    %76 = vector.broadcast %cst_23 : f32 to vector<32x128xf32>
    %77 = arith.mulf %76, %75 : vector<32x128xf32>
    %78 = arith.addf %74, %77 : vector<32x128xf32>
    %79 = vector.extract_strided_slice %52 {offsets = [64, 0], sizes = [32, 128], strides = [1, 1]} : vector<128x128xf32> to vector<32x128xf32>
    %cst_24 = arith.constant 2.325000e-01 : f32
    %80 = vector.broadcast %cst_24 : f32 to vector<32x128xf32>
    %81 = arith.mulf %80, %79 : vector<32x128xf32>
    %82 = arith.addf %78, %81 : vector<32x128xf32>
    %83 = vector.extract_strided_slice %52 {offsets = [96, 0], sizes = [32, 128], strides = [1, 1]} : vector<128x128xf32> to vector<32x128xf32>
    %cst_25 = arith.constant 2.250000e-01 : f32
    %84 = vector.broadcast %cst_25 : f32 to vector<32x128xf32>
    %85 = arith.mulf %84, %83 : vector<32x128xf32>
    %86 = arith.addf %82, %85 : vector<32x128xf32>
    %87 = vector.extract_strided_slice %71 {offsets = [0, 0], sizes = [32, 128], strides = [1, 1]} : vector<128x128xf32> to vector<32x128xf32>
    %cst_26 = arith.constant 2.475000e-01 : f32
    %88 = vector.broadcast %cst_26 : f32 to vector<32x128xf32>
    %89 = arith.mulf %88, %87 : vector<32x128xf32>
    %90 = vector.extract_strided_slice %71 {offsets = [32, 0], sizes = [32, 128], strides = [1, 1]} : vector<128x128xf32> to vector<32x128xf32>
    %cst_27 = arith.constant 2.400000e-01 : f32
    %91 = vector.broadcast %cst_27 : f32 to vector<32x128xf32>
    %92 = arith.mulf %91, %90 : vector<32x128xf32>
    %93 = arith.addf %89, %92 : vector<32x128xf32>
    %94 = vector.extract_strided_slice %71 {offsets = [64, 0], sizes = [32, 128], strides = [1, 1]} : vector<128x128xf32> to vector<32x128xf32>
    %cst_28 = arith.constant 2.325000e-01 : f32
    %95 = vector.broadcast %cst_28 : f32 to vector<32x128xf32>
    %96 = arith.mulf %95, %94 : vector<32x128xf32>
    %97 = arith.addf %93, %96 : vector<32x128xf32>
    %98 = vector.extract_strided_slice %71 {offsets = [96, 0], sizes = [32, 128], strides = [1, 1]} : vector<128x128xf32> to vector<32x128xf32>
    %cst_29 = arith.constant 2.250000e-01 : f32
    %99 = vector.broadcast %cst_29 : f32 to vector<32x128xf32>
    %100 = arith.mulf %99, %98 : vector<32x128xf32>
    %101 = arith.addf %97, %100 : vector<32x128xf32>
    %c136 = arith.constant 136 : index
    %c0_30 = arith.constant 0 : index
    %102 = vector.load %arg2[%c136, %c0_30] : memref<1416x128xf32, #tpu.memory_space<vmem>>, vector<128x128xf32>
    %cst_31 = arith.constant dense<0.000000e+00> : vector<32x128xf32>
    %103 = tpu.matmul %86, %102, %cst_31 {dimension_numbers = #tpu.dot_dimension_numbers<[1], [0], [0], [1], [0, 0, 1, 1], [], []>} : vector<32x128xf32>, vector<128x128xf32>, vector<32x128xf32> -> vector<32x128xf32>
    %104 = arith.mulf %86, %86 : vector<32x128xf32>
    %cst_32 = arith.constant dense<0.000000e+00> : vector<32xf32>
    %105 = vector.multi_reduction <add>, %104, %cst_32 [1] : vector<32x128xf32> to vector<32xf32>
    %106 = vector.shape_cast %105 : vector<32xf32> to vector<32x1xf32>
    %c5 = arith.constant 5 : index
    %c0_33 = arith.constant 0 : index
    %107 = vector.load %arg2[%c5, %c0_33] : memref<1416x128xf32, #tpu.memory_space<vmem>>, vector<1x128xf32>
    %108 = vector.broadcast %106 : vector<32x1xf32> to vector<32x128xf32>
    %109 = vector.broadcast %107 : vector<1x128xf32> to vector<32x128xf32>
    %110 = arith.addf %108, %109 : vector<32x128xf32>
    %cst_34 = arith.constant 2.000000e+00 : f32
    %111 = vector.broadcast %cst_34 : f32 to vector<32x128xf32>
    %112 = arith.mulf %111, %103 : vector<32x128xf32>
    %113 = arith.subf %110, %112 : vector<32x128xf32>
    %cst_35 = arith.constant 0.000000e+00 : f32
    %114 = vector.broadcast %cst_35 : f32 to vector<32x128xf32>
    %115 = arith.maximumf %113, %114 : vector<32x128xf32>
    %cst_36 = arith.constant -5.000000e-01 : f32
    %116 = vector.broadcast %cst_36 : f32 to vector<32x128xf32>
    %117 = arith.mulf %115, %116 : vector<32x128xf32>
    %118 = math.exp %117 : vector<32x128xf32>
    %c264 = arith.constant 264 : index
    %c0_37 = arith.constant 0 : index
    %119 = vector.load %arg2[%c264, %c0_37] : memref<1416x128xf32, #tpu.memory_space<vmem>>, vector<128x128xf32>
    %cst_38 = arith.constant dense<0.000000e+00> : vector<32x128xf32>
    %120 = tpu.matmul %101, %119, %cst_38 {dimension_numbers = #tpu.dot_dimension_numbers<[1], [0], [0], [1], [0, 0, 1, 1], [], []>} : vector<32x128xf32>, vector<128x128xf32>, vector<32x128xf32> -> vector<32x128xf32>
    %121 = arith.mulf %101, %101 : vector<32x128xf32>
    %cst_39 = arith.constant dense<0.000000e+00> : vector<32xf32>
    %122 = vector.multi_reduction <add>, %121, %cst_39 [1] : vector<32x128xf32> to vector<32xf32>
    %123 = vector.shape_cast %122 : vector<32xf32> to vector<32x1xf32>
    %c6 = arith.constant 6 : index
    %c0_40 = arith.constant 0 : index
    %124 = vector.load %arg2[%c6, %c0_40] : memref<1416x128xf32, #tpu.memory_space<vmem>>, vector<1x128xf32>
    %125 = vector.broadcast %123 : vector<32x1xf32> to vector<32x128xf32>
    %126 = vector.broadcast %124 : vector<1x128xf32> to vector<32x128xf32>
    %127 = arith.addf %125, %126 : vector<32x128xf32>
    %cst_41 = arith.constant 2.000000e+00 : f32
    %128 = vector.broadcast %cst_41 : f32 to vector<32x128xf32>
    %129 = arith.mulf %128, %120 : vector<32x128xf32>
    %130 = arith.subf %127, %129 : vector<32x128xf32>
    %cst_42 = arith.constant 0.000000e+00 : f32
    %131 = vector.broadcast %cst_42 : f32 to vector<32x128xf32>
    %132 = arith.maximumf %130, %131 : vector<32x128xf32>
    %cst_43 = arith.constant -0.347222209 : f32
    %133 = vector.broadcast %cst_43 : f32 to vector<32x128xf32>
    %134 = arith.mulf %132, %133 : vector<32x128xf32>
    %135 = math.exp %134 : vector<32x128xf32>
    %136 = vector.extract_strided_slice %118 {offsets = [0, 0], sizes = [8, 128], strides = [1, 1]} : vector<32x128xf32> to vector<8x128xf32>
    %137 = vector.extract_strided_slice %118 {offsets = [8, 0], sizes = [8, 128], strides = [1, 1]} : vector<32x128xf32> to vector<8x128xf32>
    %138 = vector.extract_strided_slice %118 {offsets = [16, 0], sizes = [8, 128], strides = [1, 1]} : vector<32x128xf32> to vector<8x128xf32>
    %139 = vector.extract_strided_slice %118 {offsets = [24, 0], sizes = [8, 128], strides = [1, 1]} : vector<32x128xf32> to vector<8x128xf32>
    %140 = vector.extract_strided_slice %135 {offsets = [0, 0], sizes = [8, 128], strides = [1, 1]} : vector<32x128xf32> to vector<8x128xf32>
    %141 = vector.extract_strided_slice %135 {offsets = [8, 0], sizes = [8, 128], strides = [1, 1]} : vector<32x128xf32> to vector<8x128xf32>
    %142 = vector.extract_strided_slice %135 {offsets = [16, 0], sizes = [8, 128], strides = [1, 1]} : vector<32x128xf32> to vector<8x128xf32>
    %143 = vector.extract_strided_slice %135 {offsets = [24, 0], sizes = [8, 128], strides = [1, 1]} : vector<32x128xf32> to vector<8x128xf32>
    %144 = tpu.concatenate %136, %137, %138, %139, %140, %141, %142, %143 in 1 : vector<8x128xf32>, vector<8x128xf32>, vector<8x128xf32>, vector<8x128xf32>, vector<8x128xf32>, vector<8x128xf32>, vector<8x128xf32>, vector<8x128xf32> -> vector<8x1024xf32>
    %c392 = arith.constant 392 : index
    %c0_44 = arith.constant 0 : index
    %145 = vector.load %arg2[%c392, %c0_44] : memref<1416x128xf32, #tpu.memory_space<vmem>>, vector<1024x128xf32>
    %cst_45 = arith.constant dense<0.000000e+00> : vector<8x128xf32>
    %146 = tpu.matmul %144, %145, %cst_45 {dimension_numbers = #tpu.dot_dimension_numbers<[1], [0], [0], [1], [0, 0, 1, 1], [], []>} : vector<8x1024xf32>, vector<1024x128xf32>, vector<8x128xf32> -> vector<8x128xf32>
    %c7 = arith.constant 7 : index
    %c0_46 = arith.constant 0 : index
    %147 = vector.load %arg2[%c7, %c0_46] : memref<1416x128xf32, #tpu.memory_space<vmem>>, vector<1x128xf32>
    %148 = vector.broadcast %147 : vector<1x128xf32> to vector<8x128xf32>
    %149 = arith.addf %146, %148 : vector<8x128xf32>
    %c0_47 = arith.constant 0 : index
    %c0_48 = arith.constant 0 : index
    %150 = vector.load %arg3[%c0_47, %c0_48] : memref<8x128xf32, #tpu.memory_space<vmem>>, vector<8x128xf32>
    tpu.vector_store %arg3[%c0_47, %c0_48], %149 {strides = array<i32>} : memref<8x128xf32, #tpu.memory_space<vmem>>, vector<8x128xf32>,
    return
  }
  func.func @transform_0(%arg0: i32) -> (i32, i32) {
    %c0_i32 = arith.constant 0 : i32
    %c0_i32_0 = arith.constant 0 : i32
    return %arg0, %c0_i32 : i32, i32
  }
  func.func @transform_1(%arg0: i32) -> (i32, i32) {
    %c0_i32 = arith.constant 0 : i32
    %c0_i32_0 = arith.constant 0 : i32
    %c0_i32_1 = arith.constant 0 : i32
    return %c0_i32, %c0_i32_0 : i32, i32
  }
  func.func @transform_2(%arg0: i32) -> (i32, i32) {
    %c0_i32 = arith.constant 0 : i32
    %c0_i32_0 = arith.constant 0 : i32
    return %arg0, %c0_i32 : i32, i32
  }
}

</mosaic_0001>

<bundles_post_ra>
// kernel: rgb_sfmcnn_v2_forward.1
= control target key start
LH: loop header
LB: loop body
LE: loop exit
PB: predicated region body
PF: predicated region fallthrough
CT: control target
= control target key end

     0   :  { %v2470_v0 = vmov 0   ;;  %v2471_v37 = vmov 1   ;;  %v2472_v41 = vmov 2   ;;  %v2473_v43 = vmov 3   ;;  %s3651_s0 = inlined_call_operand.vmem [shape: f32[128,128], index: 0, kind: input, shape index: {}]   ;;  %s3652_s1 = inlined_call_operand.vmem [shape: f32[1416,128], index: 1, kind: input, shape index: {}]   ;;  %s3653_s2 = inlined_call_operand.vmem [shape: f32[8,128], index: 2, kind: output, shape index: {}]  }
   0x1   :  { %2371 = vset.pattern.permute.xlu1 %v2470_v0  ;;  %2370 = vset.pattern.permute.xlu0 %v2470_v0  ;;  %v2494_v1 = vld [vmem:[%s3651_s0 + $0x8] sm:$0xff]  ;;  %v2499_v2 = vld [vmem:[%s3651_s0] sm:$0xff]  ;;  %v654_v4 = vld [vmem:[%s3652_s1 + $0x10] sm:$0xff]  ;;  %v108_v56 = vlaneseq }
   0x2   :  { %v653_v3 = vld [vmem:[%s3652_s1 + $0x8] sm:$0xff]  ;;  %35 = vperm.xlu1 %2371, %v2494_v1   ;;  %30 = vperm.xlu0 %2370, %v2499_v2   ;;  %v655_v7 = vld [vmem:[%s3652_s1 + $0x18] sm:$0xff]  ;;  %v656_v8 = vld [vmem:[%s3652_s1 + $0x20] sm:$0xff] }
   0x3   :  { %v2142_v5 = vpack.c.bf16 %v654_v4, %v653_v3  ;;  %v2512_v6 = vld [vmem:[%s3651_s0 + $0x28] sm:$0xff]  ;;  %2042 = vmatprep.mubr.f32.mxu0 %v2499_v2  ;;  %v2524_v9 = vld [vmem:[%s3651_s0 + $0x20] sm:$0xff]  ;;  %v2146_v10 = vpack.c.bf16 %v656_v8, %v655_v7  ;;  %v658_v12 = vld [vmem:[%s3652_s1 + $0x30] sm:$0xff]  ;;  %v109_v59 = vshrl.u32 %v108_v56, 7 }
   0x4   :  { %v657_v11 = vld [vmem:[%s3652_s1 + $0x28] sm:$0xff]  ;;  %v2542_v15 = vld [vmem:[%s3651_s0 + $0x40] sm:$0xff]  ;;  %v659_v16 = vld [vmem:[%s3652_s1 + $0x38] sm:$0xff] }
   0x5   :  { %2143 = vmatprep.subr.bf16.mxu0 %v2142_v5  ;;  %v2537_v13 = vld [vmem:[%s3651_s0 + $0x48] sm:$0xff]  ;;  %v2150_v14 = vpack.c.bf16 %v658_v12, %v657_v11  ;;  %v660_v17 = vld [vmem:[%s3652_s1 + $0x40] sm:$0xff]  ;;  %v2555_v18 = vld [vmem:[%s3651_s0 + $0x30] sm:$0xff] }
   0x6   :  { %2145 = vmatpush3.bf16.msra.mxu0 %v2142_v5  ;;  %55 = vperm.xlu1 %2371, %v2512_v6   ;;  %v2154_v19 = vpack.c.bf16 %v660_v17, %v659_v16  ;;  %v2560_v20 = vld [vmem:[%s3651_s0 + $0x10] sm:$0xff]  ;;  %v661_v21 = vld [vmem:[%s3652_s1 + $0x48] sm:$0xff]  ;;  %v2573_v23 = vld [vmem:[%s3651_s0 + $0x18] sm:$0xff] }
   0x7   :  { %50 = vperm.xlu0 %2370, %v2524_v9   ;;  %2147 = vmatprep.subr.bf16.mxu0 %v2146_v10  ;;  %v662_v22 = vld [vmem:[%s3652_s1 + $0x50] sm:$0xff]  ;;  %v2578_v25 = vld [vmem:[%s3651_s0 + $0x60] sm:$0xff]  ;;  %v663_v26 = vld [vmem:[%s3652_s1 + $0x58] sm:$0xff] }
   0x8   :  { %v2158_v24 = vpack.c.bf16 %v662_v22, %v661_v21  ;;  %v664_v27 = vld [vmem:[%s3652_s1 + $0x60] sm:$0xff]  ;;  %v2591_v28 = vld [vmem:[%s3651_s0 + $0x68] sm:$0xff]  ;;  %v2596_v30 = vld [vmem:[%s3651_s0 + $0x38] sm:$0xff] }
   0x9   :  { %v2162_v29 = vpack.c.bf16 %v664_v27, %v663_v26  ;;  %v665_v31 = vld [vmem:[%s3652_s1 + $0x68] sm:$0xff]  ;;  %v666_v32 = vld [vmem:[%s3652_s1 + $0x70] sm:$0xff]  ;;  %v667_v35 = vld [vmem:[%s3652_s1 + $0x78] sm:$0xff] }
   0xa   :  { %2149 = vmatpush3.bf16.msra.mxu0 %v2146_v10  ;;  %75 = vperm.xlu1 %2371, %v2537_v13   ;;  %v2609_v33 = vld [vmem:[%s3651_s0 + $0x50] sm:$0xff]  ;;  %v2166_v34 = vpack.c.bf16 %v666_v32, %v665_v31  ;;  %v668_v36 = vld [vmem:[%s3652_s1 + $0x80] sm:$0xff]  ;;  %v2623_v39 = vld [vmem:[%s3651_s0 + $0x58] sm:$0xff] }
   0xb   :  { %70 = vperm.xlu0 %2370, %v2542_v15   ;;  %2151 = vmatprep.subr.bf16.mxu0 %v2150_v14  ;;  %v2170_v38 = vpack.c.bf16 %v668_v36, %v667_v35  ;;  %v2638_v40 = vld [vmem:[%s3651_s0 + $0x70] sm:$0xff]  ;;  %v26_v42 = vld [vmem:[%s3651_s0 + $0x78] sm:$0xff]  ;;  %v1083_v44 = vld [vmem:[%s3652_s1 + $0x88] sm:$0xff] }
   0xc   :  { %v1084_v45 = vld [vmem:[%s3652_s1 + $0x90] sm:$0xff]  ;;  %v1085_v47 = vld [vmem:[%s3652_s1 + $0x98] sm:$0xff]  ;;  %v1086_v48 = vld [vmem:[%s3652_s1 + $0xa0] sm:$0xff] }
   0xd   :  { %v2174_v46 = vpack.c.bf16 %v1084_v45, %v1083_v44  ;;  %v2178_v49 = vpack.c.bf16 %v1086_v48, %v1085_v47  ;;  %v1087_v50 = vld [vmem:[%s3652_s1 + $0xa8] sm:$0xff]  ;;  %v1088_v51 = vld [vmem:[%s3652_s1 + $0xb0] sm:$0xff]  ;;  %v1089_v52 = vld [vmem:[%s3652_s1 + $0xb8] sm:$0xff] }
   0xe   :  { %2153 = vmatpush3.bf16.msra.mxu0 %v2150_v14  ;;  %60 = vperm.xlu1 %2371, %v2555_v18   ;;  %v2182_v53 = vpack.c.bf16 %v1088_v51, %v1087_v50  ;;  %v1090_v54 = vld [vmem:[%s3652_s1 + $0xc0] sm:$0xff]  ;;  %v1091_v62 = vld [vmem:[%s3652_s1 + $0xc8] sm:$0xff]  ;;  %v1092_v63 = vld [vmem:[%s3652_s1 + $0xd0] sm:$0xff] }
   0xf   :  { %40 = vperm.xlu0 %2370, %v2560_v20   ;;  %2155 = vmatprep.subr.bf16.mxu0 %v2154_v19  ;;  %v2186_v55 = vpack.c.bf16 %v1090_v54, %v1089_v52  ;;  %v2190_v3 = vpack.c.bf16 %v1092_v63, %v1091_v62 }
  0x10   :  { %2175 = vmatprep.subr.bf16.mxu1 %v2174_v46 }
  0x11   :  { %2177 = vmatpush3.bf16.msra.mxu1 %v2174_v46 }
  0x12   :  { %2157 = vmatpush3.bf16.msra.mxu0 %v2154_v19  ;;  %45 = vperm.xlu1 %2371, %v2573_v23  }
  0x13   :  { %90 = vperm.xlu0 %2370, %v2578_v25   ;;  %2159 = vmatprep.subr.bf16.mxu0 %v2158_v24 }
  0x14   :  { %2179 = vmatprep.subr.bf16.mxu1 %v2178_v49 }
  0x15   :  { %2181 = vmatpush3.bf16.msra.mxu1 %v2178_v49 }
  0x16   :  { %2161 = vmatpush3.bf16.msra.mxu0 %v2158_v24  ;;  %95 = vperm.xlu1 %2371, %v2591_v28   ;;  %v226_v24 = vsub.s32 1, %v109_v59 }
  0x17   :  { %65 = vperm.xlu0 %2370, %v2596_v30   ;;  %2163 = vmatprep.subr.bf16.mxu0 %v2162_v29 }
  0x18   :  { %2183 = vmatprep.subr.bf16.mxu1 %v2182_v53 }
  0x19   :  { %2185 = vmatpush3.bf16.msra.mxu1 %v2182_v53 }
  0x1a   :  { %2165 = vmatpush3.bf16.msra.mxu0 %v2162_v29  ;;  %2372 = vset.pattern.permute.xlu1 %v2471_v37  ;;  %v310_v29 = vsub.s32 2, %v109_v59 }
  0x1b   :  { %80 = vperm.xlu0 %2370, %v2609_v33   ;;  %161 = vperm.xlu1 %2372, %v2499_v2  }
  0x1c   :  { %2167 = vmatprep.subr.bf16.mxu0 %v2166_v34  ;;  %2187 = vmatprep.subr.bf16.mxu1 %v2186_v55 }
  0x1d   :  { %2189 = vmatpush3.bf16.msra.mxu1 %v2186_v55 }
  0x1e   :  { %2169 = vmatpush3.bf16.msra.mxu0 %v2166_v34  ;;  %2191 = vmatprep.subr.bf16.mxu1 %v2190_v3 }
  0x1f   :  { %2373 = vset.pattern.permute.xlu0 %v2471_v37  ;;  %2374 = vset.pattern.permute.xlu1 %v2470_v0 }
  0x20   :  { %177 = vperm.xlu0 %2373, %v2524_v9   ;;  %2171 = vmatprep.subr.bf16.mxu0 %v2170_v38 }
  0x21   :  { %85 = vperm.xlu1 %2374, %v2623_v39   ;;  %2193 = vmatpush3.bf16.msra.mxu1 %v2190_v3 }
  0x22   :  { %2173 = vmatpush3.bf16.msra.mxu0 %v2170_v38 }
  0x24   :  { %181 = vperm.xlu0 %2373, %v2512_v6  }
  0x25   :  { %2375 = vset.pattern.permute.xlu1 %v2471_v37  ;;  %2043 = vmatmul.mubr.f32.vlgmr.msra.gmra.mrb[0].mxu0 %v2494_v1 }
  0x26   :  { %165 = vperm.xlu1 %2375, %v2494_v1   ;;  %2045 = vmatprep.mubr.f32.mxu0 %v2560_v20 }
  0x28   :  { %193 = vperm.xlu0 %2373, %v2542_v15  }
  0x29   :  { %2046 = vmatmul.mubr.f32.gmra.mrb[2].mxu0 %v2573_v23 }
  0x2a   :  { %2376 = vset.pattern.permute.xlu1 %v2470_v0  ;;  %2048 = vmatprep.mubr.f32.mxu0 %v2524_v9 }
  0x2b   :  { %100 = vperm.xlu1 %2376, %v2638_v40  }
  0x2c   :  { %169 = vperm.xlu0 %2373, %v2560_v20  }
  0x2d   :  { %2049 = vmatmul.mubr.f32.gmra.mrb[4].mxu0 %v2512_v6 }
  0x2e   :  { %2051 = vmatprep.mubr.f32.mxu0 %v2555_v18 }
  0x2f   :  { %2377 = vset.pattern.permute.xlu1 %v2472_v41 }
  0x30   :  { %245 = vperm.xlu1 %2377, %v2499_v2   ;;  %213 = vperm.xlu0 %2373, %v2591_v28  }
  0x31   :  { %2052 = vmatmul.mubr.f32.gmra.mrb[6].mxu0 %v2596_v30 }
  0x32   :  { %2054 = vmatprep.mubr.f32.mxu0 %v2542_v15 }
  0x34   :  { %2378 = vset.pattern.permute.xlu1 %v2470_v0  ;;  %205 = vperm.xlu0 %2373, %v2623_v39   ;;  %v110_v0 = vsub.s32 0, %v109_v59 }
  0x35   :  { %105 = vperm.xlu1 %2378, %v26_v42   ;;  %2055 = vmatmul.mubr.f32.gmra.mrb[8].mxu0 %v2537_v13 }
  0x36   :  { %2057 = vmatprep.mubr.f32.mxu0 %v2609_v33 }
  0x38   :  { %221 = vperm.xlu0 %2373, %v26_v42  }
  0x39   :  { %2379 = vset.pattern.permute.xlu1 %v2471_v37  ;;  %2058 = vmatmul.mubr.f32.gmra.mrb[10].mxu0 %v2623_v39 }
  0x3a   :  { %197 = vperm.xlu1 %2379, %v2537_v13   ;;  %2060 = vmatprep.mubr.f32.mxu0 %v2578_v25 }
  0x3c   :  { %2387 = vset.pattern.permute.xlu0 %v2472_v41 }
  0x3d   :  { %261 = vperm.xlu0 %2387, %v2524_v9   ;;  %2061 = vmatmul.mubr.f32.gmra.mrb[12].mxu0 %v2591_v28 }
  0x3e   :  { %2380 = vset.pattern.permute.xlu1 %v2472_v41  ;;  %2063 = vmatprep.mubr.f32.mxu0 %v2638_v40 }
  0x3f   :  { %265 = vperm.xlu1 %2380, %v2512_v6  }
  0x41   :  { %249 = vperm.xlu0 %2387, %v2494_v1   ;;  %2064 = vmatmul.mubr.f32.gmra.mrb[14].mxu0 %v26_v42 }
  0x43   :  { %2381 = vset.pattern.permute.xlu1 %v2471_v37 }
  0x44   :  { %185 = vperm.xlu1 %2381, %v2555_v18  }
  0x45   :  { %277 = vperm.xlu0 %2387, %v2542_v15  }
  0x48   :  { %209 = vperm.xlu1 %2381, %v2578_v25  }
  0x49   :  { %253 = vperm.xlu0 %2387, %v2560_v20  }
  0x4c   :  { %173 = vperm.xlu1 %2381, %v2573_v23  }
  0x4d   :  { %297 = vperm.xlu0 %2387, %v2591_v28  }
  0x50   :  { %189 = vperm.xlu1 %2381, %v2596_v30  }
  0x51   :  { %305 = vperm.xlu0 %2387, %v26_v42  }
  0x54   :  { %2382 = vset.pattern.permute.xlu1 %v2472_v41 }
  0x55   :  { %281 = vperm.xlu1 %2382, %v2537_v13   ;;  %2389 = vset.pattern.permute.xlu0 %v2473_v43 }
  0x56   :  { %820 = vperm.xlu0 %2389, %v2494_v1   ;;  %v27_v1 = vld [vmem:[%s3652_s1] sm:$0x7] }
  0x57   :  { %v2733_v5 = vrot.slane %v27_v1, %v110_v0  ;;  %v2779_v45 = vrot.slane %v27_v1, %v310_v29 }
  0x59   :  { %2383 = vset.pattern.permute.xlu1 %v2471_v37 }
  0x5a   :  { %201 = vperm.xlu1 %2383, %v2609_v33   ;;  %852 = vperm.xlu0 %2389, %v2537_v13  }
  0x5e   :  { %2384 = vset.pattern.permute.xlu1 %v2472_v41  ;;  %840 = vperm.xlu0 %2389, %v2555_v18  }
  0x5f   :  { %269 = vperm.xlu1 %2384, %v2555_v18  }
  0x62   :  { %828 = vperm.xlu0 %2389, %v2573_v23  }
  0x63   :  { %293 = vperm.xlu1 %2384, %v2578_v25  }
  0x66   :  { %868 = vperm.xlu0 %2389, %v2591_v28  }
  0x67   :  { %257 = vperm.xlu1 %2384, %v2573_v23  }
  0x6a   :  { %860 = vperm.xlu0 %2389, %v2623_v39  }
  0x6b   :  { %273 = vperm.xlu1 %2384, %v2596_v30  }
  0x6e   :  { %876 = vperm.xlu0 %2389, %v26_v42  }
  0x6f   :  { %2385 = vset.pattern.permute.xlu1 %v2471_v37 }
  0x70   :  { %217 = vperm.xlu1 %2385, %v2638_v40  }
  0x74   :  { %2386 = vset.pattern.permute.xlu1 %v2472_v41 }
  0x75   :  { %285 = vperm.xlu1 %2386, %v2609_v33  }
  0x79   :  { %289 = vperm.xlu1 %2386, %v2623_v39  }
  0x7d   :  { %301 = vperm.xlu1 %2386, %v2638_v40  }
  0x81   :  { %2388 = vset.pattern.permute.xlu1 %v2473_v43  ;;  %v36_v57 = vpop.permute.xlu1 %35  ;;  %v31_v58 = vpop.permute.xlu0 %30 }
  0x82   :  { %816 = vperm.xlu1 %2388, %v2499_v2   ;;  %v112_v10 = vadd.f32 %v2733_v5, %v31_v58  ;;  %v144_v32 = vsub.f32 %v31_v58, %v2733_v5  ;;  %v145_v38 = vsub.f32 %v36_v57, %v2733_v5 }
  0x84   :  { %v128_v13 = vmul.f32 0.5, %v112_v10 }
  0x85   :  { %v56_v60 = vpop.permute.xlu1 %55 }
  0x86   :  { %832 = vperm.xlu1 %2388, %v2524_v9   ;;  %v51_v61 = vpop.permute.xlu0 %50  ;;  %v113_v9 = vadd.f32 %v2733_v5, %v36_v57  ;;  %v117_v14 = vadd.f32 %v2733_v5, %v56_v60  ;;  %v328_v21 = vmul.f32 0.00390625, %v128_v13  ;;  %v440_v42 = vsub.f32 255.0, %v128_v13 }
  0x87   :  { %v116_v16 = vadd.f32 %v2733_v5, %v51_v61  ;;  %v149_v48 = vsub.f32 %v56_v60, %v2733_v5  ;;  %v148_v53 = vsub.f32 %v51_v61, %v2733_v5 }
  0x88   :  { %v129_v12 = vmul.f32 0.5, %v113_v9  ;;  %v133_v22 = vmul.f32 0.5, %v117_v14  ;;  %v344_v34 = vadd.f32 2.0, %v328_v21  ;;  %v2792_v59 = vmul.f32 0.00390625, %v440_v42 }
  0x89   :  { %v2728_v2 = vpop.permute.xlu1 %75  ;;  %v132_v23 = vmul.f32 0.5, %v116_v16 }
  0x8a   :  { %836 = vperm.xlu1 %2388, %v2512_v6   ;;  %v2731_v4 = vpop.permute.xlu0 %70  ;;  %v329_v19 = vmul.f32 0.00390625, %v129_v12  ;;  %v333_v36 = vmul.f32 0.00390625, %v133_v22  ;;  %v441_v39 = vsub.f32 255.0, %v129_v12  ;;  %v360_v47 = vmul.f32 %v344_v34, %v144_v32 }
  0x8b   :  { %v332_v41 = vmul.f32 0.00390625, %v132_v23  ;;  %v445_v52 = vsub.f32 255.0, %v133_v22  ;;  %v444_v57 = vsub.f32 255.0, %v132_v23  ;;  %v153_v60 = vsub.f32 %v2728_v2, %v2733_v5 }
  0x8c   :  { %v345_v31 = vadd.f32 2.0, %v329_v19  ;;  %v349_v51 = vadd.f32 2.0, %v333_v36  ;;  %v2788_v56 = vmul.f32 0.00390625, %v441_v39  ;;  %v2800_v0 = vmul.f32 %v360_v47, %v144_v32 }
  0x8d   :  { %v2735_v7 = vpop.permute.xlu1 %60  ;;  %v2806_v12 = vmul.f32 0.00390625, %v445_v52  ;;  %v2809_v16 = vmul.f32 0.00390625, %v444_v57  ;;  %v1096_v52 = vld [vmem:[%s3652_s1 + $0xf0] sm:$0xff] }
  0x8e   :  { %848 = vperm.xlu1 %2388, %v2542_v15   ;;  %v2738_v8 = vpop.permute.xlu0 %40  ;;  %v121_v15 = vadd.f32 %v2733_v5, %v2728_v2  ;;  %v118_v37 = vadd.f32 %v2733_v5, %v2735_v7  ;;  %v361_v46 = vmul.f32 %v345_v31, %v145_v38  ;;  %v365_v10 = vmul.f32 %v349_v51, %v149_v48  ;;  %v1095_v51 = vld [vmem:[%s3652_s1 + $0xe8] sm:$0xff] }
  0x8f   :  { %v114_v27 = vadd.f32 %v2733_v5, %v2738_v8 }
  0x90   :  { %v2758_v26 = vmul.f32 0.5, %v121_v15  ;;  %v134_v54 = vmul.f32 0.5, %v118_v37  ;;  %v2798_v61 = vmul.f32 %v361_v46, %v145_v38  ;;  %v2828_v31 = vmul.f32 %v365_v10, %v149_v48 }
  0x91   :  { %v2742_v11 = vpop.permute.xlu1 %45  ;;  %v2776_v44 = vmul.f32 0.5, %v114_v27 }
  0x92   :  { %824 = vperm.xlu1 %2388, %v2560_v20   ;;  %v2745_v6 = vpop.permute.xlu0 %90  ;;  %v120_v20 = vadd.f32 %v2733_v5, %v2731_v4  ;;  %v337_v43 = vmul.f32 0.00390625, %v2758_v26  ;;  %v115_v58 = vadd.f32 %v2733_v5, %v2742_v11  ;;  %v449_v2 = vsub.f32 255.0, %v2758_v26 }
  0x93   :  { %v330_v63 = vmul.f32 0.00390625, %v2776_v44  ;;  %v334_v13 = vmul.f32 0.00390625, %v134_v54  ;;  %v124_v15 = vadd.f32 %v2733_v5, %v2745_v6  ;;  %v446_v26 = vsub.f32 255.0, %v134_v54 }
  0x94   :  { %v2768_v35 = vmul.f32 0.5, %v120_v20  ;;  %v353_v62 = vadd.f32 2.0, %v337_v43  ;;  %v146_v20 = vsub.f32 %v2738_v8, %v2733_v5  ;;  %v2830_v32 = vmul.f32 0.00390625, %v449_v2 }
  0x95   :  { %v2749_v17 = vpop.permute.xlu1 %95  ;;  %v346_v22 = vadd.f32 2.0, %v330_v63  ;;  %v350_v34 = vadd.f32 2.0, %v334_v13  ;;  %v442_v36 = vsub.f32 255.0, %v2776_v44  ;;  %v2838_v37 = vmul.f32 0.5, %v124_v15  ;;  %v1094_v44 = vld [vmem:[%s3652_s1 + $0xe0] sm:$0xff] }
  0x96   :  { %864 = vperm.xlu1 %2388, %v2578_v25   ;;  %v2754_v18 = vpop.permute.xlu0 %65  ;;  %v336_v49 = vmul.f32 0.00390625, %v2768_v35  ;;  %v448_v21 = vsub.f32 255.0, %v2768_v35  ;;  %v125_v27 = vadd.f32 %v2733_v5, %v2749_v17  ;;  %v2846_v42 = vsub.f32 %v2742_v11, %v2733_v5  ;;  %v1232_v63 = vld [vmem:[%s3652_s1 + $0x120] sm:$0xff] }
  0x97   :  { %v2858_v47 = vmul.f32 0.00390625, %v446_v26  ;;  %v119_v11 = vadd.f32 %v2733_v5, %v2754_v18  ;;  %v2198_v15 = vpack.c.bf16 %v1096_v52, %v1095_v51 }
  0x98   :  { %v352_v3 = vadd.f32 2.0, %v336_v49  ;;  %v2842_v39 = vmul.f32 0.00390625, %v448_v21  ;;  %v2860_v48 = vmul.f32 0.5, %v125_v27  ;;  %v1098_v21 = vld [vmem:[%s3652_s1 + $0x100] sm:$0xff] }
  0x9a   :  { %844 = vperm.xlu1 %2388, %v2596_v30   ;;  %v2763_v28 = vpop.permute.xlu1 %161  ;;  %v2765_v25 = vpop.permute.xlu0 %80  ;;  %v2773_v30 = vrot.slane %v27_v1, %v226_v24  ;;  %v152_v1 = vsub.f32 %v2731_v4, %v2733_v5  ;;  %v369_v4 = vmul.f32 %v353_v62, %v153_v60  ;;  %v2822_v24 = vsub.f32 %v2735_v7, %v2733_v5  ;;  %v1231_v62 = vld [vmem:[%s3652_s1 + $0x118] sm:$0xff] }
  0x9c   :  { %v368_v23 = vmul.f32 %v352_v3, %v152_v1  ;;  %v228_v8 = vsub.f32 %v2763_v28, %v2773_v30  ;;  %v2840_v38 = vmul.f32 %v369_v4, %v153_v60  ;;  %v1093_v28 = vld [vmem:[%s3652_s1 + $0xd8] sm:$0xff]  ;;  %v366_v54 = vmul.f32 %v350_v34, %v2822_v24  ;;  %v1230_v60 = vld [vmem:[%s3652_s1 + $0x110] sm:$0xff] }
  0x9d   :  { %v2194_v10 = vpack.c.bf16 %v1094_v44, %v1093_v28  ;;  %v1097_v4 = vld [vmem:[%s3652_s1 + $0xf8] sm:$0xff]  ;;  %v2210_v34 = vpack.c.bf16 %v1232_v63, %v1231_v62  ;;  %v1233_v28 = vld [vmem:[%s3652_s1 + $0x128] sm:$0xff]  ;;  %v1234_v44 = vld [vmem:[%s3652_s1 + $0x130] sm:$0xff] }
  0x9e   :  { %856 = vperm.xlu1 %2388, %v2609_v33   ;;  %v348_v33 = vadd.f32 2.0, %v332_v41  ;;  %v362_v41 = vmul.f32 %v346_v22, %v146_v20  ;;  %v2856_v46 = vmul.f32 %v368_v23, %v152_v1  ;;  %v392_v57 = vmul.f32 4.0, %v228_v8 }
  0x9f   :  { %v2783_v50 = vpop.permute.xlu0 %177  ;;  %v2888_v1 = vmul.f32 0.00390625, %v442_v36  ;;  %v341_v22 = vmul.f32 0.00390625, %v2860_v48  ;;  %v2899_v23 = vmul.f32 0.5, %v119_v11  ;;  %2195 = vmatprep.subr.bf16.mxu1 %v2194_v10  ;;  %v122_v36 = vadd.f32 %v2733_v5, %v2765_v25 }
  0xa0   :  { %v2786_v55 = vpop.permute.xlu1 %85  ;;  %v364_v14 = vmul.f32 %v348_v33, %v148_v53  ;;  %v2876_v33 = vsub.f32 %v2745_v6, %v2733_v5  ;;  %v340_v6 = vmul.f32 0.00390625, %v2838_v37  ;;  %v378_v2 = vmul.f32 %v362_v41, %v146_v20  ;;  %2197 = vmatpush3.bf16.msra.mxu1 %v2194_v10 }
  0xa1   :  { %2199 = vmatprep.subr.bf16.mxu1 %v2198_v15  ;;  %v2202_v51 = vpack.c.bf16 %v1098_v21, %v1097_v4  ;;  %v2915_v52 = vmul.f32 %v366_v54, %v2822_v24  ;;  %v357_v62 = vadd.f32 2.0, %v341_v22  ;;  %v138_v54 = vmul.f32 0.5, %v122_v36  ;;  %v2952_v36 = vld [vmem:[%s3652_s1 + $0x3] ss:$0 sm:$0xff] }
  0xa2   :  { %872 = vperm.xlu1 %2388, %v2638_v40   ;;  %v2811_v40 = vmul.f32 0.5, %v115_v58  ;;  %v2834_v35 = vmul.f32 %v364_v14, %v148_v53  ;;  %v1229_v53 = vld [vmem:[%s3652_s1 + $0x108] sm:$0xff]  ;;  %v472_v14 = vadd.f32 2.0, %v2792_v59  ;;  %v408_v59 = vmul.f32 %v392_v57, %v228_v8 }
  0xa3   :  { %v2804_v9 = vpop.permute.xlu0 %181  ;;  %v2206_v20 = vpack.c.bf16 %v1230_v60, %v1229_v53  ;;  %v452_v8 = vsub.f32 255.0, %v2838_v37  ;;  %v453_v53 = vsub.f32 255.0, %v2860_v48  ;;  %v157_v60 = vsub.f32 %v2749_v17, %v2733_v5  ;;  %v1235_v17 = vld [vmem:[%s3652_s1 + $0x138] sm:$0xff] }
  0xa4   :  { %v331_v7 = vmul.f32 0.00390625, %v2811_v40  ;;  %v443_v11 = vsub.f32 255.0, %v2811_v40  ;;  %v335_v40 = vmul.f32 0.00390625, %v2899_v23  ;;  %v2214_v37 = vpack.c.bf16 %v1234_v44, %v1233_v28  ;;  %2201 = vmatpush3.bf16.msra.mxu1 %v2198_v15  ;;  %v1238_v28 = vld [vmem:[%s3652_s1 + $0x150] sm:$0xff] }
  0xa5   :  { %v2815_v19 = vpop.permute.xlu1 %165  ;;  %2207 = vmatprep.subr.bf16.mxu0 %v2206_v20  ;;  %v424_v24 = vadd.f32 %v408_v59, %v2800_v0  ;;  %v232_v0 = vsub.f32 %v2783_v50, %v2773_v30  ;;  %2203 = vmatprep.subr.bf16.mxu1 %v2202_v51  ;;  %v2942_v4 = vmul.f32 0.00390625, %v453_v53  ;;  %v151_v15 = vsub.f32 %v2754_v18, %v2733_v5 }
  0xa6   :  { %v347_v3 = vadd.f32 2.0, %v331_v7  ;;  %2209 = vmatpush3.bf16.msra.mxu0 %v2206_v20  ;;  %v233_v21 = vsub.f32 %v2804_v9, %v2773_v30  ;;  %v351_v20 = vadd.f32 2.0, %v335_v40  ;;  %v447_v59 = vsub.f32 255.0, %v2899_v23  ;;  %v1237_v23 = vld [vmem:[%s3652_s1 + $0x148] sm:$0xff] }
  0xa7   :  { %v2826_v29 = vpop.permute.xlu0 %193  ;;  %2211 = vmatprep.subr.bf16.mxu0 %v2210_v34  ;;  %v229_v9 = vsub.f32 %v2815_v19, %v2773_v30  ;;  %v476_v19 = vadd.f32 2.0, %v2809_v16 }
  0xa8   :  { %2205 = vmatpush3.bf16.msra.mxu1 %v2202_v51  ;;  %v123_v51 = vadd.f32 %v2733_v5, %v2786_v55  ;;  %v397_v53 = vmul.f32 4.0, %v233_v21  ;;  %v2982_v40 = vmul.f32 0.00390625, %v447_v59  ;;  %v236_v16 = vsub.f32 %v2826_v29, %v2773_v30 }
  0xa9   :  { %v477_v29 = vadd.f32 2.0, %v2806_v12  ;;  %v473_v12 = vadd.f32 2.0, %v2788_v56 }
  0xaa   :  { %v2848_v43 = vpop.permute.xlu1 %100  ;;  %2213 = vmatpush3.bf16.msra.mxu0 %v2210_v34 }
  0xab   :  { %v170_v49 = vpop.permute.xlu0 %169  ;;  %2215 = vmatprep.subr.bf16.mxu0 %v2214_v37 }
  0xac   :  { %v230_v58 = vsub.f32 %v170_v49, %v2773_v30  ;;  %v356_v49 = vadd.f32 2.0, %v340_v6  ;;  %v363_v6 = vmul.f32 %v347_v3, %v2846_v42  ;;  %v2938_v3 = vmul.f32 0.00390625, %v452_v8 }
  0xad   :  { %v450_v8 = vsub.f32 255.0, %v138_v54 }
  0xae   :  { %v394_v13 = vmul.f32 4.0, %v230_v58  ;;  %v2957_v18 = vmul.f32 %v363_v6, %v2846_v42  ;;  %v2972_v42 = vsub.f32 %v2765_v25, %v2733_v5  ;;  %2217 = vmatpush3.bf16.msra.mxu0 %v2214_v37  ;;  %v2222_v25 = vpack.c.bf16 %v1238_v28, %v1237_v23  ;;  %v1239_v37 = vld [vmem:[%s3652_s1 + $0x158] sm:$0xff] }
  0xaf   :  { %v246_v26 = vpop.permute.xlu1 %245  ;;  %v2901_v27 = vpop.permute.xlu0 %213 }
  0xb0   :  { %v410_v7 = vmul.f32 %v394_v13, %v230_v58  ;;  %v312_v41 = vsub.f32 %v246_v26, %v2779_v45  ;;  %v2935_v13 = vmul.f32 0.00390625, %v443_v11  ;;  %v373_v26 = vmul.f32 %v357_v62, %v157_v60 }
  0xb1   :  { %v396_v11 = vmul.f32 4.0, %v232_v0 }
  0xb2   :  { %v2918_v57 = vadd.f32 %v410_v7, %v378_v2  ;;  %v488_v58 = vmul.f32 %v472_v14, %v312_v41  ;;  %v1236_v2 = vld [vmem:[%s3652_s1 + $0x140] sm:$0xff]  ;;  %v372_v14 = vmul.f32 %v356_v49, %v2876_v33  ;;  %v2980_v62 = vmul.f32 %v373_v26, %v157_v60 }
  0xb3   :  { %v2923_v63 = vpop.permute.xlu0 %205  ;;  %v2218_v7 = vpack.c.bf16 %v1236_v2, %v1235_v17  ;;  %v1240_v60 = vld [vmem:[%s3652_s1 + $0x160] sm:$0xff]  ;;  %v412_v17 = vmul.f32 %v396_v11, %v232_v0  ;;  %v2996_v2 = vsub.f32 %v2786_v55, %v2733_v5  ;;  %v3002_v26 = vmul.f32 0.5, %v123_v51 }
  0xb4   :  { %v504_v48 = vmul.f32 %v488_v58, %v312_v41  ;;  %v2927_v10 = vpop.permute.xlu1 %105  ;;  %v338_v41 = vmul.f32 0.00390625, %v138_v54  ;;  %v2968_v44 = vmul.f32 %v372_v14, %v2876_v33  ;;  %v367_v33 = vmul.f32 %v351_v20, %v151_v15 }
  0xb5   :  { %2219 = vmatprep.subr.bf16.mxu0 %v2218_v7  ;;  %v127_v54 = vadd.f32 %v2733_v5, %v2927_v10  ;;  %v413_v20 = vmul.f32 %v397_v53, %v233_v21  ;;  %v2226_v55 = vpack.c.bf16 %v1240_v60, %v1239_v37  ;;  %v400_v11 = vmul.f32 4.0, %v236_v16  ;;  %v1241_v21 = vld [vmem:[%s3652_s1 + $0x168] sm:$0xff] }
  0xb6   :  { %v520_v22 = vadd.f32 %v504_v48, %v424_v24  ;;  %v354_v6 = vadd.f32 2.0, %v338_v41  ;;  %v393_v24 = vmul.f32 4.0, %v229_v9  ;;  %2221 = vmatpush3.bf16.msra.mxu0 %v2218_v7  ;;  %v428_v7 = vadd.f32 %v412_v17, %v2834_v35  ;;  %v1243_v17 = vld [vmem:[%s3652_s1 + $0x178] sm:$0xff] }
  0xb7   :  { %v2954_v50 = vpop.permute.xlu0 %221  ;;  %2223 = vmatprep.subr.bf16.mxu0 %v2222_v25  ;;  %v429_v56 = vadd.f32 %v413_v20, %v2828_v31  ;;  %v3032_v31 = vmul.f32 0.00390625, %v3002_v26 }
  0xb8   :  { %v536_v34 = vadd.f32 1e-08, %v520_v22  ;;  %v3000_v22 = vmul.f32 0.00390625, %v450_v8  ;;  %v409_v28 = vmul.f32 %v393_v24, %v229_v9  ;;  %v3019_v53 = vmul.f32 %v354_v6, %v2972_v42  ;;  %v1244_v6 = vld [vmem:[%s3652_s1 + $0x180] sm:$0xff] }
  0xb9   :  { %v2974_v49 = vpop.permute.xlu1 %197 }
  0xba   :  { %v557_v58 = vadd.f32 %v2952_v36, %v536_v34  ;;  %v3004_v34 = vmul.f32 %v367_v33, %v151_v15  ;;  %v1242_v15 = vld [vmem:[%s3652_s1 + $0x170] sm:$0xff]  ;;  %v480_v33 = vadd.f32 2.0, %v2842_v39  ;;  %2225 = vmatpush3.bf16.msra.mxu0 %v2222_v25  ;;  %v425_v39 = vadd.f32 %v409_v28, %v2798_v61 }
  0xbb   :  { %2227 = vmatprep.subr.bf16.mxu0 %v2226_v55  ;;  %v2230_v35 = vpack.c.bf16 %v1242_v15, %v1241_v21  ;;  %v416_v25 = vmul.f32 %v400_v11, %v236_v16 }
  0xbc   :  { %v262_v48 = vpop.permute.xlu0 %261  ;;  %v573_v59 = vmul.f32 -9.493025e-06, %v557_v58 }
  0xbd   :  { %v316_v14 = vsub.f32 %v262_v48, %v2779_v45  ;;  %v3007_v48 = vmul.f32 0.5, %v127_v54  ;;  %v432_v15 = vadd.f32 %v416_v25, %v2856_v46  ;;  %v237_v25 = vsub.f32 %v2974_v49, %v2773_v30 }
  0xbe   :  { %v266_v41 = vpop.permute.xlu1 %265  ;;  %v589_v58 = vmul.f32 1.442695, %v573_v59  ;;  %2229 = vmatpush3.bf16.msra.mxu0 %v2226_v55 }
  0xbf   :  { %v492_v23 = vmul.f32 %v476_v19, %v316_v14  ;;  %v317_v0 = vsub.f32 %v266_v41, %v2779_v45  ;;  %2231 = vmatprep.subr.bf16.mxu0 %v2230_v35 }
  0xc0   :  { %v250_v8 = vpop.permute.xlu0 %249  ;;  %2390 = vpow2.f32 %v589_v58 }
  0xc1   :  { %v508_v19 = vmul.f32 %v492_v23, %v316_v14  ;;  %v493_v51 = vmul.f32 %v477_v29, %v317_v0  ;;  %v313_v9 = vsub.f32 %v250_v8, %v2779_v45  ;;  %v343_v14 = vmul.f32 0.00390625, %v3007_v48 }
  0xc2   :  { %v2234_v8 = vpack.c.bf16 %v1244_v6, %v1243_v17  ;;  %2233 = vmatpush3.bf16.msra.mxu0 %v2230_v35 }
  0xc3   :  { %v524_v24 = vadd.f32 %v508_v19, %v428_v7  ;;  %v509_v54 = vmul.f32 %v493_v51, %v317_v0  ;;  %v489_v37 = vmul.f32 %v473_v12, %v313_v9  ;;  %v3023_v60 = vpop.permute.xlu1 %185  ;;  %v241_v0 = vsub.f32 %v2901_v27, %v2773_v30 }
  0xc4   :  { %v278_v29 = vpop.permute.xlu0 %277  ;;  %v243_v12 = vsub.f32 %v2954_v50, %v2773_v30  ;;  %v359_v7 = vadd.f32 2.0, %v343_v14  ;;  %v455_v19 = vsub.f32 255.0, %v3007_v48  ;;  %v474_v27 = vadd.f32 2.0, %v2888_v1  ;;  %2235 = vmatprep.subr.bf16.mxu0 %v2234_v8 }
  0xc5   :  { %v540_v20 = vadd.f32 1e-08, %v524_v24  ;;  %v525_v59 = vadd.f32 %v509_v54, %v429_v56  ;;  %v505_v41 = vmul.f32 %v489_v37, %v313_v9  ;;  %v320_v23 = vsub.f32 %v278_v29, %v2779_v45 }
  0xc6   :  { %v405_v58 = vmul.f32 4.0, %v241_v0  ;;  %v407_v24 = vmul.f32 4.0, %v243_v12  ;;  %2237 = vmatpush3.bf16.msra.mxu0 %v2234_v8  ;;  %v451_v8 = vsub.f32 255.0, %v3002_v26 }
  0xc7   :  { %v561_v61 = vadd.f32 %v2952_v36, %v540_v20  ;;  %v541_v16 = vadd.f32 1e-08, %v525_v59  ;;  %v521_v28 = vadd.f32 %v505_v41, %v425_v39  ;;  %v496_v11 = vmul.f32 %v480_v33, %v320_v23  ;;  %v3042_v21 = vpop.permute.xlu1 %209 }
  0xc8   :  { %v254_v51 = vpop.permute.xlu0 %253  ;;  %v159_v33 = vsub.f32 %v2927_v10, %v2733_v5  ;;  %v471_v39 = vmul.f32 0.00390625, %v455_v19  ;;  %v421_v35 = vmul.f32 %v405_v58, %v241_v0  ;;  %v401_v19 = vmul.f32 4.0, %v237_v25 }
  0xc9   :  { %v577_v9 = vmul.f32 -9.493025e-06, %v561_v61  ;;  %v562_v50 = vadd.f32 %v2952_v36, %v541_v16  ;;  %v537_v55 = vadd.f32 1e-08, %v521_v28  ;;  %v512_v56 = vmul.f32 %v496_v11, %v320_v23 }
  0xca   :  { %v314_v54 = vsub.f32 %v254_v51, %v2779_v45  ;;  %v375_v6 = vmul.f32 %v359_v7, %v159_v33  ;;  %v485_v23 = vadd.f32 2.0, %v2942_v4  ;;  %v423_v16 = vmul.f32 %v407_v24, %v243_v12  ;;  %v2391_v49 = vpop.eup %2390 }
  0xcb   :  { %v597_v46 = vmul.f32 1.442695, %v577_v9  ;;  %v578_v37 = vmul.f32 -9.493025e-06, %v562_v50  ;;  %v558_v48 = vadd.f32 %v2952_v36, %v537_v55  ;;  %v528_v17 = vadd.f32 %v512_v56, %v432_v15  ;;  %v3052_v1 = vpop.permute.xlu1 %173 }
  0xcc   :  { %v490_v14 = vmul.f32 %v474_v27, %v314_v54  ;;  %v298_v29 = vpop.permute.xlu0 %297  ;;  %v391_v7 = vmul.f32 %v375_v6, %v159_v33  ;;  %v487_v4 = vadd.f32 2.0, %v471_v39  ;;  %v3065_v12 = vmul.f32 %v3019_v53, %v2972_v42 }
  0xcd   :  { %2392 = vpow2.f32 %v597_v46  ;;  %v599_v10 = vmul.f32 1.442695, %v578_v37  ;;  %v574_v20 = vmul.f32 -9.493025e-06, %v558_v48  ;;  %v544_v59 = vadd.f32 1e-08, %v528_v17 }
  0xce   :  { %v506_v41 = vmul.f32 %v490_v14, %v314_v54  ;;  %v325_v61 = vsub.f32 %v298_v29, %v2779_v45  ;;  %v437_v55 = vadd.f32 %v421_v35, %v2980_v62  ;;  %v355_v58 = vadd.f32 2.0, %v3032_v31 }
  0xcf   :  { %2394 = vpow2.f32 %v599_v10  ;;  %v591_v28 = vmul.f32 1.442695, %v574_v20  ;;  %v565_v11 = vadd.f32 %v2952_v36, %v544_v59  ;;  %v3059_v15 = vpop.permute.xlu1 %189  ;;  %v481_v24 = vadd.f32 2.0, %v2830_v32 }
  0xd0   :  { %v522_v27 = vadd.f32 %v506_v41, %v2918_v57  ;;  %v501_v51 = vmul.f32 %v485_v23, %v325_v61  ;;  %v306_v0 = vpop.permute.xlu0 %305  ;;  %v439_v54 = vadd.f32 %v423_v16, %v391_v7  ;;  %v417_v46 = vmul.f32 %v401_v19, %v237_v25 }
  0xd1   :  { %2396 = vpow2.f32 %v591_v28  ;;  %v581_v9 = vmul.f32 -9.493025e-06, %v565_v11  ;;  %v327_v50 = vsub.f32 %v306_v0, %v2779_v45  ;;  %vm621_vm0 = vcmp.ge.f32.partialorder %v2391_v49, 0.7 }
  0xd2   :  { %v517_v56 = vmul.f32 %v501_v51, %v325_v61  ;;  %v234_v42 = vsub.f32 %v3023_v60, %v2773_v30  ;;  %v3076_v17 = vmul.f32 0.00390625, %v451_v8  ;;  %v478_v6 = vadd.f32 2.0, %v2858_v47 }
  0xd3   :  { %v605_v33 = vmul.f32 1.442695, %v581_v9  ;;  %v503_v57 = vmul.f32 %v487_v4, %v327_v50  ;;  %v3080_v32 = vadd.f32 2.0, %v2938_v3  ;;  %v538_v25 = vadd.f32 1e-08, %v522_v27 }
  0xd4   :  { %v533_v37 = vadd.f32 %v517_v56, %v437_v55  ;;  %v282_v48 = vpop.permute.xlu1 %281  ;;  %v637_v10 = vsel %vm621_vm0, %v2391_v49, 0.0  ;;  %v3083_v60 = vmul.f32 %v355_v58, %v2996_v2  ;;  %v433_v20 = vadd.f32 %v417_v46, %v2840_v38 }
  0xd5   :  { %2398 = vpow2.f32 %v605_v33  ;;  %v519_v53 = vmul.f32 %v503_v57, %v327_v50  ;;  %v321_v26 = vsub.f32 %v282_v48, %v2779_v45  ;;  %v3074_v62 = vpop.permute.xlu0 %820  ;;  %v398_v41 = vmul.f32 4.0, %v234_v42 }
  0xd6   :  { %v549_v31 = vadd.f32 1e-08, %v533_v37  ;;  %v126_v16 = vadd.f32 %v2733_v5, %v2848_v43  ;;  %v240_v28 = vsub.f32 %v3042_v21, %v2773_v30  ;;  %v1027_v49 = vmul.f32 0.2475, %v637_v10 }
  0xd7   :  { %v2393_v39 = vpop.eup %2392  ;;  %v535_v14 = vadd.f32 %v519_v53, %v439_v54  ;;  %v497_v29 = vmul.f32 %v481_v24, %v321_v26  ;;  %v559_v38 = vadd.f32 %v2952_v36, %v538_v25  ;;  %v414_v50 = vmul.f32 %v398_v41, %v234_v42 }
  0xd8   :  { %v570_v59 = vadd.f32 %v2952_v36, %v549_v31  ;;  %vm625_vm1 = vcmp.ge.f32.partialorder %v2393_v39, 0.7  ;;  %v404_v21 = vmul.f32 4.0, %v240_v28  ;;  %v231_v58 = vsub.f32 %v3052_v1, %v2773_v30 }
  0xd9   :  { %v2395_v35 = vpop.eup %2394  ;;  %v551_v23 = vadd.f32 1e-08, %v535_v14  ;;  %v513_v47 = vmul.f32 %v497_v29, %v321_v26  ;;  %v3087_v61 = vpop.permute.xlu1 %201  ;;  %v641_v3 = vsel %vm625_vm1, %v2393_v39, 0.0  ;;  %v575_v46 = vmul.f32 -9.493025e-06, %v559_v38 }
  0xda   :  { %v586_v11 = vmul.f32 -9.493025e-06, %v570_v59  ;;  %v3094_v27 = vpop.permute.xlu0 %852  ;;  %vm626_vm2 = vcmp.ge.f32.partialorder %v2395_v35, 0.7  ;;  %v1031_v51 = vmul.f32 0.24, %v641_v3  ;;  %v430_v31 = vadd.f32 %v414_v50, %v2915_v52 }
  0xdb   :  { %v2397_v7 = vpop.eup %2396  ;;  %v529_v19 = vadd.f32 %v513_v47, %v433_v20  ;;  %v572_v9 = vadd.f32 %v2952_v36, %v551_v23  ;;  %v642_v4 = vsel %vm626_vm2, %v2395_v35, 0.0  ;;  %v142_v53 = vmul.f32 0.5, %v126_v16 }
  0xdc   :  { %v615_v0 = vmul.f32 1.442695, %v586_v11  ;;  %vm622_vm3 = vcmp.ge.f32.partialorder %v2397_v7, 0.7  ;;  %v1035_v56 = vadd.f32 %v1031_v51, %v1027_v49  ;;  %v1032_v24 = vmul.f32 0.24, %v642_v4 }
  0xdd   :  { %v545_v8 = vadd.f32 1e-08, %v529_v19  ;;  %v638_v55 = vsel %vm622_vm3, %v2397_v7, 0.0  ;;  %v588_v26 = vmul.f32 -9.493025e-06, %v572_v9  ;;  %v420_v29 = vmul.f32 %v404_v21, %v240_v28 }
  0xde   :  { %v270_v33 = vpop.permute.xlu1 %269  ;;  %v1028_v57 = vmul.f32 0.2475, %v638_v55  ;;  %2400 = vpow2.f32 %v615_v0  ;;  %v3104_v1 = vpop.permute.xlu0 %840  ;;  %v395_v10 = vmul.f32 4.0, %v231_v58  ;;  %v235_v20 = vsub.f32 %v3059_v15, %v2773_v30 }
  0xdf   :  { %v2399_v54 = vpop.eup %2398  ;;  %v566_v37 = vadd.f32 %v2952_v36, %v545_v8  ;;  %v318_v48 = vsub.f32 %v270_v33, %v2779_v45  ;;  %v593_v41 = vmul.f32 1.442695, %v575_v46  ;;  %v3111_v52 = vsub.f32 %v2848_v43, %v2733_v5 }
  0xe0   :  { %v3101_v42 = vadd.f32 %v1032_v24, %v1028_v57  ;;  %vm629_vm4 = vcmp.ge.f32.partialorder %v2399_v54, 0.7  ;;  %v475_v16 = vadd.f32 2.0, %v2935_v13  ;;  %v342_v28 = vmul.f32 0.00390625, %v142_v53 }
  0xe1   :  { %v582_v39 = vmul.f32 -9.493025e-06, %v566_v37  ;;  %v494_v25 = vmul.f32 %v478_v6, %v318_v48  ;;  %v645_v14 = vsel %vm629_vm4, %v2399_v54, 0.0  ;;  %v619_v6 = vmul.f32 1.442695, %v588_v26 }
  0xe2   :  { %v294_v59 = vpop.permute.xlu1 %293  ;;  %v1039_v35 = vmul.f32 0.2325, %v645_v14  ;;  %v239_v7 = vsub.f32 %v2923_v63, %v2773_v30  ;;  %v436_v38 = vadd.f32 %v420_v29, %v2968_v44  ;;  %v411_v19 = vmul.f32 %v395_v10, %v231_v58  ;;  %v3121_v9 = vpop.permute.xlu0 %828 }
  0xe3   :  { %v607_v23 = vmul.f32 1.442695, %v582_v39  ;;  %v510_v47 = vmul.f32 %v494_v25, %v318_v48  ;;  %v324_v3 = vsub.f32 %v294_v59, %v2779_v45  ;;  %v399_v51 = vmul.f32 4.0, %v235_v20 }
  0xe4   :  { %v3114_v11 = vadd.f32 %v1039_v35, %v1035_v56  ;;  %v387_v4 = vmul.f32 %v3083_v60, %v2996_v2  ;;  %v454_v50 = vsub.f32 255.0, %v142_v53  ;;  %v358_v8 = vadd.f32 2.0, %v342_v28 }
  0xe5   :  { %2402 = vpow2.f32 %v607_v23  ;;  %v526_v49 = vadd.f32 %v510_v47, %v430_v31  ;;  %v500_v15 = vmul.f32 %v3080_v32, %v324_v3  ;;  %v479_v32 = vadd.f32 2.0, %v2982_v40 }
  0xe6   :  { %v258_v0 = vpop.permute.xlu1 %257  ;;  %2404 = vpow2.f32 %v593_v41  ;;  %v403_v21 = vmul.f32 4.0, %v239_v7  ;;  %v427_v58 = vadd.f32 %v411_v19, %v2957_v18  ;;  %v415_v33 = vmul.f32 %v399_v51, %v235_v20  ;;  %v869_v39 = vpop.permute.xlu0 %868 }
  0xe7   :  { %v542_v5 = vadd.f32 1e-08, %v526_v49  ;;  %v516_v43 = vmul.f32 %v500_v15, %v324_v3  ;;  %v315_v13 = vsub.f32 %v258_v0, %v2779_v45  ;;  %2406 = vpow2.f32 %v619_v6 }
  0xe8   :  { %v2401_v63 = vpop.eup %2400  ;;  %v238_v57 = vsub.f32 %v3087_v61, %v2773_v30  ;;  %v470_v40 = vmul.f32 0.00390625, %v454_v50  ;;  %v482_v37 = vadd.f32 2.0, %v3000_v22  ;;  %v3133_v48 = vadd.f32 2.0, %v3076_v17 }
  0xe9   :  { %v563_v44 = vadd.f32 %v2952_v36, %v542_v5  ;;  %v532_v55 = vadd.f32 %v516_v43, %v436_v38  ;;  %v491_v56 = vmul.f32 %v475_v16, %v315_v13  ;;  %vm634_vm5 = vcmp.ge.f32.partialorder %v2401_v63, 0.7 }
  0xea   :  { %v274_v24 = vpop.permute.xlu1 %273  ;;  %v374_v61 = vmul.f32 %v358_v8, %v3111_v52  ;;  %v419_v25 = vmul.f32 %v403_v21, %v239_v7  ;;  %v431_v14 = vadd.f32 %v415_v33, %v3004_v34  ;;  %v402_v29 = vmul.f32 4.0, %v238_v57  ;;  %v861_v5 = vpop.permute.xlu0 %860 }
  0xeb   :  { %v579_v54 = vmul.f32 -9.493025e-06, %v563_v44  ;;  %v548_v2 = vadd.f32 1e-08, %v532_v55  ;;  %v507_v60 = vmul.f32 %v491_v56, %v315_v13  ;;  %v319_v46 = vsub.f32 %v274_v24, %v2779_v45 }
  0xec   :  { %v650_v41 = vsel %vm634_vm5, %v2401_v63, 0.0  ;;  %v3140_v23 = vadd.f32 2.0, %v470_v40  ;;  %v390_v49 = vmul.f32 %v374_v61, %v3111_v52  ;;  %v3144_v15 = vadd.f32 %v419_v25, %v387_v4 }
  0xed   :  { %v601_v53 = vmul.f32 1.442695, %v579_v54  ;;  %v569_v18 = vadd.f32 %v2952_v36, %v548_v2  ;;  %v523_v26 = vadd.f32 %v507_v60, %v427_v58  ;;  %v495_v31 = vmul.f32 %v479_v32, %v319_v46 }
  0xee   :  { %v418_v7 = vmul.f32 %v402_v29, %v238_v57  ;;  %v1048_v4 = vmul.f32 0.225, %v650_v41 }
  0xef   :  { %v2403_v10 = vpop.eup %2402  ;;  %2408 = vpow2.f32 %v601_v53  ;;  %v585_v20 = vmul.f32 -9.493025e-06, %v569_v18  ;;  %v539_v22 = vadd.f32 1e-08, %v523_v26  ;;  %v511_v59 = vmul.f32 %v495_v31, %v319_v46  ;;  %v218_v17 = vpop.permute.xlu1 %217 }
  0xf0   :  { %v242_v35 = vsub.f32 %v218_v17, %v2773_v30  ;;  %vm630_vm6 = vcmp.ge.f32.partialorder %v2403_v10, 0.7  ;;  %v2405_v47 = vpop.eup %2404  ;;  %v3149_v30 = vld [vmem:[%s3652_s1 + $0x4] ss:$0 sm:$0xff]  ;;  %v434_v8 = vadd.f32 %v418_v7, %v3065_v12  ;;  %v877_v53 = vpop.permute.xlu0 %876 }
  0xf1   :  { %v613_v3 = vmul.f32 1.442695, %v585_v20  ;;  %v560_v6 = vadd.f32 %v2952_v36, %v539_v22  ;;  %v527_v16 = vadd.f32 %v511_v59, %v431_v14  ;;  %v646_v34 = vsel %vm630_vm6, %v2403_v10, 0.0  ;;  %v2407_v28 = vpop.eup %2406 }
  0xf2   :  { %v1040_v38 = vmul.f32 0.2325, %v646_v34  ;;  %v884_v0 = vadd.f32 %v3149_v30, %v3074_v62  ;;  %v406_v43 = vmul.f32 4.0, %v242_v35  ;;  %vm623_vm7 = vcmp.ge.f32.partialorder %v2405_v47, 0.7 }
  0xf3   :  { %2410 = vpow2.f32 %v613_v3  ;;  %v576_v19 = vmul.f32 -9.493025e-06, %v560_v6  ;;  %v543_v51 = vadd.f32 1e-08, %v527_v16  ;;  %v3158_v63 = vadd.f32 %v3149_v30, %v3094_v27 }
  0xf4   :  { %v286_v13 = vpop.permute.xlu1 %285  ;;  %v1044_v52 = vadd.f32 %v1040_v38, %v3101_v42  ;;  %vm636_vm8 = vcmp.ge.f32.partialorder %v2407_v28, 0.7  ;;  %v3165_v55 = vadd.f32 %v3149_v30, %v3104_v1  ;;  %v886_v21 = vadd.f32 %v3149_v30, %v3121_v9 }
  0xf5   :  { %v564_v50 = vadd.f32 %v2952_v36, %v543_v51  ;;  %v322_v32 = vsub.f32 %v286_v13, %v2779_v45  ;;  %v595_v44 = vmul.f32 1.442695, %v576_v19  ;;  %v639_v58 = vsel %vm623_vm7, %v2405_v47, 0.0 }
  0xf6   :  { %v3161_v62 = vadd.f32 %v1048_v4, %v1044_v52  ;;  %v422_v33 = vmul.f32 %v406_v43, %v242_v35  ;;  %v3172_v12 = vadd.f32 %v3149_v30, %v869_v39  ;;  %v652_v54 = vsel %vm636_vm8, %v2407_v28, 0.0 }
  0xf7   :  { %v580_v42 = vmul.f32 -9.493025e-06, %v564_v50  ;;  %v498_v56 = vmul.f32 %v482_v37, %v322_v32  ;;  %2412 = vpow2.f32 %v595_v44  ;;  %v3176_v9 = vadd.f32 %v3149_v30, %v861_v5 }
  0xf8   :  { %v290_v57 = vpop.permute.xlu1 %289  ;;  %v1185_v27 = vmul.f32 %v3161_v62, %v3161_v62  ;;  %v2044_v24 = vpop.f32.mrb[0].mxu0  ;;  %v1029_v18 = vmul.f32 0.2475, %v639_v58  ;;  %v438_v61 = vadd.f32 %v422_v33, %v390_v49  ;;  %v3180_v29 = vadd.f32 %v3149_v30, %v877_v53 }
  0xf9   :  { %v2409_v2 = vpop.eup %2408  ;;  %v603_v60 = vmul.f32 1.442695, %v580_v42  ;;  %v514_v1 = vmul.f32 %v498_v56, %v322_v32  ;;  %v323_v46 = vsub.f32 %v290_v57, %v2779_v45  ;;  %v900_v40 = vmul.f32 2.0, %v2044_v24  ;;  %v735_v37 = vpop.f32.mrb[1].mxu0 }
  0xfa   :  { %1190 = vadd.xlane.f32.xlu1 %v1185_v27  ;;  %vm627_vm9 = vcmp.ge.f32.partialorder %v2409_v2, 0.7  ;;  %v3182_v20 = vmul.f32 0.225, %v652_v54  ;;  %v899_v3 = vmul.f32 2.0, %v735_v37 }
  0xfb   :  { %2414 = vpow2.f32 %v603_v60  ;;  %v530_v26 = vadd.f32 %v514_v1, %v434_v8  ;;  %v499_v31 = vmul.f32 %v3133_v48, %v323_v46  ;;  %v916_v39 = vsub.f32 %v884_v0, %v900_v40 }
  0xfc   :  { %v302_v25 = vpop.permute.xlu1 %301  ;;  %v2047_v14 = vpop.f32.mrb[2].mxu0  ;;  %v643_v10 = vsel %vm627_vm9, %v2409_v2, 0.0 }
  0xfd   :  { %v2411_v22 = vpop.eup %2410  ;;  %v546_v59 = vadd.f32 1e-08, %v530_v26  ;;  %v515_v17 = vmul.f32 %v499_v31, %v323_v46  ;;  %v326_v35 = vsub.f32 %v302_v25, %v2779_v45  ;;  %v932_v41 = vmax.f32 %v916_v39, 0.0  ;;  %v745_v47 = vpop.f32.mrb[3].mxu0 }
  0xfe   :  { %v902_v6 = vmul.f32 2.0, %v2047_v14  ;;  %vm633_vm10 = vcmp.ge.f32.partialorder %v2411_v22, 0.7  ;;  %v1033_v48 = vmul.f32 0.24, %v643_v10  ;;  %v3188_v38 = vmul.f32 2.0, %v745_v47 }
  0xff   :  { %v567_v16 = vadd.f32 %v2952_v36, %v546_v59  ;;  %v531_v34 = vadd.f32 %v515_v17, %v3144_v15  ;;  %v502_v28 = vmul.f32 %v3140_v23, %v326_v35  ;;  %v948_v49 = vmul.f32 -1.3888888, %v932_v41 }
 0x100   :  { %v918_v7 = vsub.f32 %v886_v21, %v902_v6  ;;  %v2050_v19 = vpop.f32.mrb[4].mxu0  ;;  %v649_v51 = vsel %vm633_vm10, %v2411_v22, 0.0  ;;  %v3190_v0 = vadd.f32 %v1033_v48, %v1029_v18 }
 0x101   :  { %v583_v45 = vmul.f32 -9.493025e-06, %v567_v16  ;;  %v547_v5 = vadd.f32 1e-08, %v531_v34  ;;  %v518_v43 = vmul.f32 %v502_v28, %v326_v35  ;;  %v965_v13 = vmul.f32 1.442695, %v948_v49  ;;  %v817_v52 = vpop.permute.xlu1 %816  ;;  %v2413_v56 = vpop.eup %2412 }
 0x102   :  { %v883_v4 = vadd.f32 %v3149_v30, %v817_v52  ;;  %v934_v50 = vmax.f32 %v918_v7, 0.0  ;;  %v3193_v32 = vmul.f32 2.0, %v2050_v19  ;;  %v1047_v15 = vmul.f32 0.225, %v649_v51  ;;  %v755_v23 = vpop.f32.mrb[5].mxu0 }
 0x103   :  { %v609_v8 = vmul.f32 1.442695, %v583_v45  ;;  %v568_v44 = vadd.f32 %v2952_v36, %v547_v5  ;;  %v534_v42 = vadd.f32 %v518_v43, %v438_v61  ;;  %2416 = vpow2.f32 %v965_v13 }
 0x104   :  { %v915_v21 = vsub.f32 %v883_v4, %v899_v3  ;;  %v950_v58 = vmul.f32 -1.3888888, %v934_v50  ;;  %v1051_v33 = vadd.f32 %v1047_v15, %v3114_v11  ;;  %v903_v57 = vmul.f32 2.0, %v755_v23  ;;  %v2053_v27 = vpop.f32.mrb[6].mxu0 }
 0x105   :  { %v2415_v24 = vpop.eup %2414  ;;  %2418 = vpow2.f32 %v609_v8  ;;  %v584_v54 = vmul.f32 -9.493025e-06, %v568_v44  ;;  %v550_v2 = vadd.f32 1e-08, %v534_v42  ;;  %v833_v60 = vpop.permute.xlu1 %832  ;;  %v3197_v1 = vmul.f32 2.0, %v2053_v27 }
 0x106   :  { %v765_v46 = vpop.f32.mrb[7].mxu0  ;;  %v931_v40 = vmax.f32 %v915_v21, 0.0  ;;  %v969_v37 = vmul.f32 1.442695, %v950_v58  ;;  %2098 = vmatprep.mubr.f32.mxu1 %v1051_v33  ;;  %v887_v53 = vadd.f32 %v3149_v30, %v833_v60  ;;  %v1184_v18 = vmul.f32 %v1051_v33, %v1051_v33 }
 0x107   :  { %v611_v26 = vmul.f32 1.442695, %v584_v54  ;;  %v571_v31 = vadd.f32 %v2952_v36, %v550_v2  ;;  %2099 = vmatmul.mubr.f32.vlgmr.msra.gmra.mrb[0].mxu1 %v3161_v62  ;;  %v905_v11 = vmul.f32 2.0, %v765_v46  ;;  %vm624_vm11 = vcmp.ge.f32.partialorder %v2413_v56, 0.7 }
 0x108   :  { %v947_v39 = vmul.f32 -1.3888888, %v931_v40  ;;  %2420 = vpow2.f32 %v969_v37  ;;  %v919_v61 = vsub.f32 %v887_v53, %v903_v57  ;;  %1188 = vadd.xlane.f32.xlu0 %v1184_v18  ;;  %v2056_v25 = vpop.f32.mrb[8].mxu0  ;;  %vm628_vm12 = vcmp.ge.f32.partialorder %v2415_v24, 0.7 }
 0x109   :  { %2422 = vpow2.f32 %v611_v26  ;;  %v587_v14 = vmul.f32 -9.493025e-06, %v571_v31  ;;  %v921_v10 = vsub.f32 %v3165_v55, %v905_v11  ;;  %v837_v22 = vpop.permute.xlu1 %836  ;;  %v908_v59 = vmul.f32 2.0, %v2056_v25  ;;  %v775_v17 = vpop.f32.mrb[9].mxu0 }
 0x10a   :  { %v963_v35 = vmul.f32 1.442695, %v947_v39  ;;  %v935_v41 = vmax.f32 %v919_v61, 0.0  ;;  %v888_v36 = vadd.f32 %v3149_v30, %v837_v22  ;;  %v907_v62 = vmul.f32 2.0, %v775_v17 }
 0x10b   :  { %v617_v47 = vmul.f32 1.442695, %v587_v14  ;;  %v937_v3 = vmax.f32 %v921_v10, 0.0  ;;  %v924_v6 = vsub.f32 %v3158_v63, %v908_v59  ;;  %v640_v48 = vsel %vm624_vm11, %v2413_v56, 0.0 }
 0x10c   :  { %2424 = vpow2.f32 %v963_v35  ;;  %v951_v16 = vmul.f32 -1.3888888, %v935_v41  ;;  %v920_v34 = vsub.f32 %v888_v36, %v3193_v32  ;;  %v2059_v28 = vpop.f32.mrb[10].mxu0  ;;  %v3208_v55 = vsel %vm628_vm12, %v2415_v24, 0.0 }
 0x10d   :  { %v3210_v49 = vpop.eup %2416  ;;  %2426 = vpow2.f32 %v617_v47  ;;  %v953_v7 = vmul.f32 -1.3888888, %v937_v3  ;;  %v940_v19 = vmax.f32 %v924_v6, 0.0  ;;  %v910_v51 = vmul.f32 2.0, %v2059_v28  ;;  %v849_v45 = vpop.permute.xlu1 %848 }
 0x10e   :  { %v785_v5 = vpop.f32.mrb[11].mxu0  ;;  %v971_v43 = vmul.f32 1.442695, %v951_v16  ;;  %v936_v63 = vmax.f32 %v920_v34, 0.0  ;;  %v891_v13 = vadd.f32 %v3149_v30, %v849_v45  ;;  %v1030_v23 = vmul.f32 0.2475, %v640_v48 }
 0x10f   :  { %v3213_v52 = vmul.f32 2.0, %v785_v5  ;;  %v2419_v4 = vpop.eup %2418  ;;  %v975_v50 = vmul.f32 1.442695, %v953_v7  ;;  %v956_v32 = vmul.f32 -1.3888888, %v940_v19  ;;  %v926_v15 = vsub.f32 %v3176_v9, %v910_v51 }
 0x110   :  { %2428 = vpow2.f32 %v971_v43  ;;  %v952_v8 = vmul.f32 -1.3888888, %v936_v63  ;;  %v923_v44 = vsub.f32 %v891_v13, %v907_v62  ;;  %v2062_v42 = vpop.f32.mrb[12].mxu0  ;;  %vm631_vm13 = vcmp.ge.f32.partialorder %v2419_v4, 0.7 }
 0x111   :  { %2430 = vpow2.f32 %v975_v50  ;;  %v981_v56 = vmul.f32 1.442695, %v956_v32  ;;  %v942_v21 = vmax.f32 %v926_v15, 0.0  ;;  %v912_v58 = vmul.f32 2.0, %v2062_v42  ;;  %v825_v33 = vpop.permute.xlu1 %824  ;;  %v795_v57 = vpop.f32.mrb[13].mxu0 }
 0x112   :  { %v3216_v27 = vpop.eup %2420  ;;  %v973_v24 = vmul.f32 1.442695, %v952_v8  ;;  %v939_v54 = vmax.f32 %v923_v44, 0.0  ;;  %v885_v2 = vadd.f32 %v3149_v30, %v825_v33  ;;  %v911_v60 = vmul.f32 2.0, %v795_v57 }
 0x113   :  { %v2423_v9 = vpop.eup %2422  ;;  %2432 = vpow2.f32 %v981_v56  ;;  %v958_v46 = vmul.f32 -1.3888888, %v942_v21  ;;  %v928_v40 = vsub.f32 %v3172_v12, %v912_v58  ;;  %v647_v37 = vsel %vm631_vm13, %v2419_v4, 0.0 }
 0x114   :  { %2434 = vpow2.f32 %v973_v24  ;;  %v955_v53 = vmul.f32 -1.3888888, %v939_v54  ;;  %v917_v18 = vsub.f32 %v885_v2, %v3188_v38  ;;  %v2065_v26 = vpop.f32.mrb[14].mxu0  ;;  %v1041_v31 = vmul.f32 0.2325, %v647_v37 }
 0x115   :  { %v985_v11 = vmul.f32 1.442695, %v958_v46  ;;  %v944_v39 = vmax.f32 %v928_v40, 0.0  ;;  %v914_v61 = vmul.f32 2.0, %v2065_v26  ;;  %v865_v25 = vpop.permute.xlu1 %864  ;;  %vm632_vm14 = vcmp.ge.f32.partialorder %v2423_v9, 0.7 }
 0x116   :  { %v3222_v14 = vpop.eup %2424  ;;  %v979_v10 = vmul.f32 1.442695, %v955_v53  ;;  %v933_v22 = vmax.f32 %v917_v18, 0.0  ;;  %v895_v59 = vadd.f32 %v3149_v30, %v865_v25  ;;  %v1045_v12 = vadd.f32 %v1041_v31, %v3190_v0  ;;  %v805_v17 = vpop.f32.mrb[15].mxu0 }
 0x117   :  { %v2427_v35 = vpop.eup %2426  ;;  %2436 = vpow2.f32 %v985_v11  ;;  %v960_v41 = vmul.f32 -1.3888888, %v944_v39  ;;  %v930_v38 = vsub.f32 %v3180_v29, %v914_v61  ;;  %v648_v36 = vsel %vm632_vm14, %v2423_v9, 0.0 }
 0x118   :  { %2438 = vpow2.f32 %v979_v10  ;;  %v949_v62 = vmul.f32 -1.3888888, %v933_v22  ;;  %v927_v47 = vsub.f32 %v895_v59, %v911_v60  ;;  %vm635_vm15 = vcmp.ge.f32.partialorder %v2427_v35, 0.7 }
 0x119   :  { %v989_v3 = vmul.f32 1.442695, %v960_v41  ;;  %v946_v6 = vmax.f32 %v930_v38, 0.0  ;;  %v845_v48 = vpop.permute.xlu1 %844  ;;  %v651_v16 = vsel %vm635_vm15, %v2427_v35, 0.0  ;;  %v1034_v34 = vmul.f32 0.24, %v3208_v55 }
 0x11a   :  { %v2429_v28 = vpop.eup %2428  ;;  %v967_v7 = vmul.f32 1.442695, %v949_v62  ;;  %v943_v0 = vmax.f32 %v927_v47, 0.0  ;;  %v890_v19 = vadd.f32 %v3149_v30, %v845_v48  ;;  %v1049_v51 = vmul.f32 0.225, %v651_v16 }
 0x11b   :  { %v3229_v45 = vpop.eup %2430  ;;  %2440 = vpow2.f32 %v989_v3  ;;  %v962_v29 = vmul.f32 -1.3888888, %v946_v6  ;;  %v1038_v5 = vadd.f32 %v1034_v34, %v1030_v23  ;;  %v1042_v43 = vmul.f32 0.2325, %v648_v36 }
 0x11c   :  { %2442 = vpow2.f32 %v967_v7  ;;  %v959_v63 = vmul.f32 -1.3888888, %v943_v0  ;;  %v922_v13 = vsub.f32 %v890_v19, %v3197_v1  ;;  %v1053_v4 = vadd.f32 %v1049_v51, %v1045_v12 }
 0x11d   :  { %v2433_v50 = vpop.eup %2432  ;;  %v993_v32 = vmul.f32 1.442695, %v962_v29  ;;  %v857_v55 = vpop.permute.xlu1 %856  ;;  %v1046_v15 = vadd.f32 %v1042_v43, %v1038_v5  ;;  %v913_v8 = vmul.f32 2.0, %v805_v17  ;;  %vm996_vm0 = vcmp.ge.f32.partialorder %v3210_v49, 0.7 }
 0x11e   :  { %v2435_v44 = vpop.eup %2434  ;;  %v987_v42 = vmul.f32 1.442695, %v959_v63  ;;  %v938_v56 = vmax.f32 %v922_v13, 0.0  ;;  %v893_v21 = vadd.f32 %v3149_v30, %v857_v55  ;;  %2101 = vmatprep.mubr.f32.mxu1 %v1053_v4  ;;  %v1186_v23 = vmul.f32 %v1053_v4, %v1053_v4 }
 0x11f   :  { %2444 = vpow2.f32 %v993_v32  ;;  %v1054_v58 = vadd.f32 %v3182_v20, %v1046_v15  ;;  %vm1000_vm1 = vcmp.ge.f32.partialorder %v2435_v44, 0.7  ;;  %vm1004_vm2 = vcmp.ge.f32.partialorder %v2433_v50, 0.7 }
 0x120   :  { %2446 = vpow2.f32 %v987_v42  ;;  %v954_v1 = vmul.f32 -1.3888888, %v938_v56  ;;  %v925_v33 = vsub.f32 %v893_v21, %v3213_v52  ;;  %1192 = vadd.xlane.f32.xlu1 %v1186_v23  ;;  %v1012_v57 = vsel %vm996_vm0, %v3210_v49, 0.0 }
 0x121   :  { %v3237_v24 = vpop.eup %2436  ;;  %v1187_v54 = vmul.f32 %v1054_v58, %v1054_v58  ;;  %2102 = vmatmul.mubr.f32.gmra.mrb[2].mxu1 %v1054_v58  ;;  %v873_v2 = vpop.permute.xlu1 %872  ;;  %v1016_v60 = vsel %vm1000_vm1, %v2435_v44, 0.0  ;;  %v1020_v9 = vsel %vm1004_vm2, %v2433_v50, 0.0  ;;  %v1056_v46 = vmul.f32 0.2475, %v1012_v57 }
 0x122   :  { %v2439_v40 = vpop.eup %2438  ;;  %v977_v37 = vmul.f32 1.442695, %v954_v1  ;;  %v941_v20 = vmax.f32 %v925_v33, 0.0  ;;  %v897_v53 = vadd.f32 %v3149_v30, %v873_v2  ;;  %v1060_v18 = vmul.f32 0.24, %v1016_v60  ;;  %v1391_v60 = vld [vmem:[%s3652_s1 + $0x208] sm:$0xff] }
 0x123   :  { %1194 = vadd.xlane.f32.xlu0 %v1187_v54  ;;  %v1068_v26 = vmul.f32 0.2325, %v1020_v9  ;;  %vm995_vm3 = vcmp.ge.f32.partialorder %v3222_v14, 0.7  ;;  %vm999_vm4 = vcmp.ge.f32.partialorder %v2429_v28, 0.7 }
 0x124   :  { %2448 = vpow2.f32 %v977_v37  ;;  %v957_v49 = vmul.f32 -1.3888888, %v941_v20  ;;  %v929_v52 = vsub.f32 %v897_v53, %v913_v8  ;;  %v1064_v31 = vadd.f32 %v1060_v18, %v1056_v46  ;;  %v1392_v9 = vld [vmem:[%s3652_s1 + $0x210] sm:$0xff]  ;;  %v1375_v46 = vld [vmem:[%s3652_s1 + $0x188] sm:$0xff]  ;;  %v1393_v20 = vld [vmem:[%s3652_s1 + $0x218] sm:$0xff] }
 0x125   :  { %v2441_v11 = vpop.eup %2440  ;;  %vm1003_vm5 = vcmp.ge.f32.partialorder %v2439_v40, 0.7  ;;  %v1011_v39 = vsel %vm995_vm3, %v3222_v14, 0.0  ;;  %v1015_v61 = vsel %vm999_vm4, %v2429_v28, 0.0  ;;  %vm998_vm8 = vcmp.ge.f32.partialorder %v3216_v27, 0.7 }
 0x126   :  { %v2443_v25 = vpop.eup %2442  ;;  %v983_v10 = vmul.f32 1.442695, %v957_v49  ;;  %v945_v22 = vmax.f32 %v929_v52, 0.0  ;;  %vm1008_vm6 = vcmp.ge.f32.partialorder %v2441_v11, 0.7  ;;  %v1072_v30 = vadd.f32 %v1068_v26, %v1064_v31  ;;  %v1376_v37 = vld [vmem:[%s3652_s1 + $0x190] sm:$0xff] }
 0x127   :  { %v1024_v59 = vsel %vm1008_vm6, %v2441_v11, 0.0  ;;  %v1019_v12 = vsel %vm1003_vm5, %v2439_v40, 0.0  ;;  %v1055_v17 = vmul.f32 0.2475, %v1011_v39  ;;  %v1059_v35 = vmul.f32 0.24, %v1015_v61 }
 0x128   :  { %2450 = vpow2.f32 %v983_v10  ;;  %v961_v41 = vmul.f32 -1.3888888, %v945_v22  ;;  %v1076_v38 = vmul.f32 0.225, %v1024_v59  ;;  %v1067_v36 = vmul.f32 0.2325, %v1019_v12 }
 0x129   :  { %v2445_v62 = vpop.eup %2444  ;;  %v1063_v47 = vadd.f32 %v1059_v35, %v1055_v17  ;;  %vm997_vm9 = vcmp.ge.f32.partialorder %v2443_v25, 0.7  ;;  %vm1006_vm10 = vcmp.ge.f32.partialorder %v3237_v24, 0.7  ;;  %vm1001_vm11 = vcmp.ge.f32.partialorder %v3229_v45, 0.7 }
 0x12a   :  { %v2447_v3 = vpop.eup %2446  ;;  %v991_v6 = vmul.f32 1.442695, %v961_v41  ;;  %v1080_v48 = vadd.f32 %v1076_v38, %v1072_v30  ;;  %vm1010_vm12 = vcmp.ge.f32.partialorder %v2445_v62, 0.7  ;;  %v1014_v0 = vsel %vm998_vm8, %v3216_v27, 0.0  ;;  %v1394_v53 = vld [vmem:[%s3652_s1 + $0x220] sm:$0xff] }
 0x12b   :  { %vm1007_vm7 = vcmp.ge.f32.partialorder %v2447_v3, 0.7  ;;  %v1071_v14 = vadd.f32 %v1067_v36, %v1063_v47  ;;  %v1013_v19 = vsel %vm997_vm9, %v2443_v25, 0.0  ;;  %v1017_v51 = vsel %vm1001_vm11, %v3229_v45, 0.0  ;;  %v1377_v49 = vld [vmem:[%s3652_s1 + $0x198] sm:$0xff]  ;;  %v1378_v52 = vld [vmem:[%s3652_s1 + $0x1a0] sm:$0xff] }
 0x12c   :  { %2452 = vpow2.f32 %v991_v6  ;;  %v1331_v16 = vmul.f32 %v1080_v48, %v1080_v48  ;;  %v1023_v34 = vsel %vm1007_vm7, %v2447_v3, 0.0  ;;  %v1057_v5 = vmul.f32 0.2475, %v1013_v19  ;;  %v1395_v31 = vld [vmem:[%s3652_s1 + $0x228] sm:$0xff]  ;;  %v1396_v11 = vld [vmem:[%s3652_s1 + $0x230] sm:$0xff]  ;;  %v1397_v30 = vld [vmem:[%s3652_s1 + $0x238] sm:$0xff] }
 0x12d   :  { %v1075_v28 = vmul.f32 0.225, %v1023_v34  ;;  %v1061_v43 = vmul.f32 0.24, %v1017_v51  ;;  %v1022_v13 = vsel %vm1006_vm10, %v3237_v24, 0.0  ;;  %v1026_v8 = vsel %vm1010_vm12, %v2445_v62, 0.0 }
 0x12e   :  { %v2449_v7 = vpop.eup %2448  ;;  %1336 = vadd.xlane.f32.xlu0 %v1331_v16  ;;  %v1058_v50 = vmul.f32 0.2475, %v1014_v0  ;;  %v1070_v44 = vmul.f32 0.2325, %v1022_v13  ;;  %v1078_v56 = vmul.f32 0.225, %v1026_v8  ;;  %v2238_v40 = vpack.c.bf16 %v1392_v9, %v1391_v60 }
 0x12f   :  { %v1079_v29 = vadd.f32 %v1075_v28, %v1071_v14  ;;  %vm1002_vm13 = vcmp.ge.f32.partialorder %v2449_v7, 0.7  ;;  %v1065_v55 = vadd.f32 %v1061_v43, %v1057_v5  ;;  %v2240_v18 = vpack.c.bf16 %v1376_v37, %v1375_v46  ;;  %v1379_v25 = vld [vmem:[%s3652_s1 + $0x1a8] sm:$0xff]  ;;  %v1380_v10 = vld [vmem:[%s3652_s1 + $0x1b0] sm:$0xff]  ;;  %v1398_v59 = vld [vmem:[%s3652_s1 + $0x240] sm:$0xff] }
 0x130   :  { %v1018_v63 = vsel %vm1002_vm13, %v2449_v7, 0.0  ;;  %v2242_v26 = vpack.c.bf16 %v1394_v53, %v1393_v20  ;;  %2239 = vmatprep.subr.bf16.mxu1 %v2238_v40  ;;  %v2244_v39 = vpack.c.bf16 %v1378_v52, %v1377_v49  ;;  %v2246_v61 = vpack.c.bf16 %v1396_v11, %v1395_v31  ;;  %v1381_v12 = vld [vmem:[%s3652_s1 + $0x1b8] sm:$0xff]  ;;  %v1382_v35 = vld [vmem:[%s3652_s1 + $0x1c0] sm:$0xff]  ;;  %v1399_v41 = vld [vmem:[%s3652_s1 + $0x248] sm:$0xff] }
 0x131   :  { %2136 = vmatprep.mubr.f32.mxu0 %v1079_v29  ;;  %v1330_v4 = vmul.f32 %v1079_v29, %v1079_v29  ;;  %v1062_v32 = vmul.f32 0.24, %v1018_v63  ;;  %2241 = vmatpush3.bf16.msra.mxu1 %v2240_v18  ;;  %v2248_v22 = vpack.c.bf16 %v1380_v10, %v1379_v25  ;;  %v2250_v17 = vpack.c.bf16 %v1398_v59, %v1397_v30  ;;  %v1400_v38 = vld [vmem:[%s3652_s1 + $0x250] sm:$0xff]  ;;  %v1383_v47 = vld [vmem:[%s3652_s1 + $0x1c8] sm:$0xff]  ;;  %v1401_v6 = vld [vmem:[%s3652_s1 + $0x258] sm:$0xff] }
 0x132   :  { %v2451_v15 = vpop.eup %2450  ;;  %2137 = vmatmul.mubr.f32.vlgmr.msra.gmra.mrb[16].mxu0 %v1080_v48  ;;  %2243 = vmatprep.subr.bf16.mxu1 %v2242_v26  ;;  %v2252_v36 = vpack.c.bf16 %v1382_v35, %v1381_v12  ;;  %v2254_v62 = vpack.c.bf16 %v1400_v38, %v1399_v41  ;;  %v1384_v3 = vld [vmem:[%s3652_s1 + $0x1d0] sm:$0xff]  ;;  %v1402_v48 = vld [vmem:[%s3652_s1 + $0x260] sm:$0xff]  ;;  %v1423_v14 = vld [vmem:[%s3652_s1 + $0x308] sm:$0xff] }
 0x133   :  { %1334 = vadd.xlane.f32.xlu1 %v1330_v4  ;;  %v1066_v27 = vadd.f32 %v1062_v32, %v1058_v50  ;;  %vm1005_vm14 = vcmp.ge.f32.partialorder %v2451_v15, 0.7  ;;  %v1424_v16 = vld [vmem:[%s3652_s1 + $0x310] sm:$0xff]  ;;  %v2256_v34 = vpack.c.bf16 %v1384_v3, %v1383_v47  ;;  %v1385_v28 = vld [vmem:[%s3652_s1 + $0x1d8] sm:$0xff]  ;;  %v1407_v0 = vld [vmem:[%s3652_s1 + $0x288] sm:$0xff]  ;;  %v2258_v51 = vpack.c.bf16 %v1402_v48, %v1401_v6 }
 0x134   :  { %v1021_v45 = vsel %vm1005_vm14, %v2451_v15, 0.0  ;;  %v2270_v7 = vpack.c.bf16 %v1424_v16, %v1423_v14  ;;  %v1408_v19 = vld [vmem:[%s3652_s1 + $0x290] sm:$0xff]  ;;  %v1386_v29 = vld [vmem:[%s3652_s1 + $0x1e0] sm:$0xff]  ;;  %v1403_v5 = vld [vmem:[%s3652_s1 + $0x268] sm:$0xff] }
 0x135   :  { %v1074_v42 = vadd.f32 %v1070_v44, %v1066_v27  ;;  %v1069_v21 = vmul.f32 0.2325, %v1021_v45  ;;  %2245 = vmatpush3.bf16.msra.mxu1 %v2244_v39  ;;  %v1404_v43 = vld [vmem:[%s3652_s1 + $0x270] sm:$0xff]  ;;  %v2272_v63 = vpack.c.bf16 %v1408_v19, %v1407_v0  ;;  %v1425_v13 = vld [vmem:[%s3652_s1 + $0x318] sm:$0xff]  ;;  %v1426_v4 = vld [vmem:[%s3652_s1 + $0x320] sm:$0xff]  ;;  %v2260_v15 = vpack.c.bf16 %v1386_v29, %v1385_v28 }
 0x136   :  { %v2453_v23 = vpop.eup %2452  ;;  %2247 = vmatprep.subr.bf16.mxu1 %v2246_v61  ;;  %2271 = vmatprep.subr.bf16.mxu0 %v2270_v7  ;;  %v1409_v50 = vld [vmem:[%s3652_s1 + $0x298] sm:$0xff]  ;;  %v2274_v32 = vpack.c.bf16 %v1426_v4, %v1425_v13  ;;  %v1387_v8 = vld [vmem:[%s3652_s1 + $0x1e8] sm:$0xff]  ;;  %v1388_v27 = vld [vmem:[%s3652_s1 + $0x1f0] sm:$0xff]  ;;  %v2262_v45 = vpack.c.bf16 %v1404_v43, %v1403_v5 }
 0x137   :  { %v1082_v58 = vadd.f32 %v1078_v56, %v1074_v42  ;;  %vm1009_vm15 = vcmp.ge.f32.partialorder %v2453_v23, 0.7  ;;  %v1073_v1 = vadd.f32 %v1069_v21, %v1065_v55  ;;  %2273 = vmatpush3.bf16.msra.mxu0 %v2272_v63  ;;  %v1410_v55 = vld [vmem:[%s3652_s1 + $0x2a0] sm:$0xff]  ;;  %v1427_v42 = vld [vmem:[%s3652_s1 + $0x328] sm:$0xff]  ;;  %v1428_v56 = vld [vmem:[%s3652_s1 + $0x330] sm:$0xff] }
 0x138   :  { %v1025_v33 = vsel %vm1009_vm15, %v2453_v23, 0.0  ;;  %v2276_v44 = vpack.c.bf16 %v1410_v55, %v1409_v50  ;;  %2275 = vmatprep.subr.bf16.mxu0 %v2274_v32  ;;  %v1411_v21 = vld [vmem:[%s3652_s1 + $0x2a8] sm:$0xff]  ;;  %v1405_v23 = vld [vmem:[%s3652_s1 + $0x278] sm:$0xff]  ;;  %v1390_v60 = vld [vmem:[%s3652_s1 + $0x200] sm:$0xff] }
 0x139   :  { %v1333_v57 = vmul.f32 %v1082_v58, %v1082_v58  ;;  %v1077_v24 = vmul.f32 0.225, %v1025_v33  ;;  %2249 = vmatpush3.bf16.msra.mxu1 %v2248_v22  ;;  %v1412_v33 = vld [vmem:[%s3652_s1 + $0x2b0] sm:$0xff]  ;;  %v1429_v46 = vld [vmem:[%s3652_s1 + $0x338] sm:$0xff]  ;;  %v1430_v40 = vld [vmem:[%s3652_s1 + $0x340] sm:$0xff] }
 0x13a   :  { %2251 = vmatprep.subr.bf16.mxu1 %v2250_v17  ;;  %v1413_v37 = vld [vmem:[%s3652_s1 + $0x2b8] sm:$0xff]  ;;  %v2282_v20 = vpack.c.bf16 %v1430_v40, %v1429_v46  ;;  %v1414_v53 = vld [vmem:[%s3652_s1 + $0x2c0] sm:$0xff]  ;;  %v1431_v18 = vld [vmem:[%s3652_s1 + $0x348] sm:$0xff] }
 0x13b   :  { %1340 = vadd.xlane.f32.xlu0 %v1333_v57  ;;  %v1081_v54 = vadd.f32 %v1077_v24, %v1073_v1  ;;  %v2278_v1 = vpack.c.bf16 %v1428_v56, %v1427_v42  ;;  %2277 = vmatpush3.bf16.msra.mxu0 %v2276_v44  ;;  %v2280_v57 = vpack.c.bf16 %v1412_v33, %v1411_v21  ;;  %v1432_v26 = vld [vmem:[%s3652_s1 + $0x350] sm:$0xff]  ;;  %v1415_v31 = vld [vmem:[%s3652_s1 + $0x2c8] sm:$0xff]  ;;  %v1433_v39 = vld [vmem:[%s3652_s1 + $0x358] sm:$0xff] }
 0x13c   :  { %v2264_v24 = vpack.c.bf16 %v1388_v27, %v1387_v8  ;;  %v2284_v49 = vpack.c.bf16 %v1414_v53, %v1413_v37  ;;  %v2286_v52 = vpack.c.bf16 %v1432_v26, %v1431_v18  ;;  %v1416_v11 = vld [vmem:[%s3652_s1 + $0x2d0] sm:$0xff]  ;;  %v1434_v61 = vld [vmem:[%s3652_s1 + $0x360] sm:$0xff]  ;;  %v1455_v25 = vld [vmem:[%s3652_s1 + $0x408] sm:$0xff] }
 0x13d   :  { %2139 = vmatprep.mubr.f32.mxu0 %v1081_v54  ;;  %v1332_v2 = vmul.f32 %v1081_v54, %v1081_v54  ;;  %2253 = vmatpush3.bf16.msra.mxu1 %v2252_v36  ;;  %v1456_v10 = vld [vmem:[%s3652_s1 + $0x410] sm:$0xff]  ;;  %v2288_v22 = vpack.c.bf16 %v1416_v11, %v1415_v31  ;;  %v2290_v59 = vpack.c.bf16 %v1434_v61, %v1433_v39  ;;  %v1417_v12 = vld [vmem:[%s3652_s1 + $0x2d8] sm:$0xff]  ;;  %v1418_v17 = vld [vmem:[%s3652_s1 + $0x2e0] sm:$0xff] }
 0x13e   :  { %2140 = vmatmul.mubr.f32.gmra.mrb[18].mxu0 %v1082_v58  ;;  %2255 = vmatprep.subr.bf16.mxu1 %v2254_v62  ;;  %v1406_v58 = vld [vmem:[%s3652_s1 + $0x280] sm:$0xff]  ;;  %v2302_v30 = vpack.c.bf16 %v1456_v10, %v1455_v25  ;;  %v1435_v35 = vld [vmem:[%s3652_s1 + $0x368] sm:$0xff]  ;;  %v1436_v41 = vld [vmem:[%s3652_s1 + $0x370] sm:$0xff]  ;;  %v2292_v38 = vpack.c.bf16 %v1418_v17, %v1417_v12 }
 0x13f   :  { %1338 = vadd.xlane.f32.xlu1 %v1332_v2  ;;  %2279 = vmatprep.subr.bf16.mxu0 %v2278_v1  ;;  %v2266_v54 = vpack.c.bf16 %v1406_v58, %v1405_v23  ;;  %v1389_v2 = vld [vmem:[%s3652_s1 + $0x1f8] sm:$0xff]  ;;  %v2294_v36 = vpack.c.bf16 %v1436_v41, %v1435_v35  ;;  %v1419_v62 = vld [vmem:[%s3652_s1 + $0x2e8] sm:$0xff]  ;;  %v1420_v47 = vld [vmem:[%s3652_s1 + $0x2f0] sm:$0xff] }
 0x140   :  { %2281 = vmatpush3.bf16.msra.mxu0 %v2280_v57  ;;  %v2268_v9 = vpack.c.bf16 %v1390_v60, %v1389_v2  ;;  %v1437_v3 = vld [vmem:[%s3652_s1 + $0x378] sm:$0xff]  ;;  %v1438_v6 = vld [vmem:[%s3652_s1 + $0x380] sm:$0xff]  ;;  %v2296_v48 = vpack.c.bf16 %v1420_v47, %v1419_v62  ;;  %v1487_v7 = vld [vmem:[%s3652_s1 + $0x508] sm:$0xff] }
 0x141   :  { %2257 = vmatpush3.bf16.msra.mxu1 %v2256_v34  ;;  %2283 = vmatprep.subr.bf16.mxu0 %v2282_v20  ;;  %v2298_v14 = vpack.c.bf16 %v1438_v6, %v1437_v3  ;;  %v1421_v16 = vld [vmem:[%s3652_s1 + $0x2f8] sm:$0xff]  ;;  %v1422_v34 = vld [vmem:[%s3652_s1 + $0x300] sm:$0xff]  ;;  %v1488_v0 = vld [vmem:[%s3652_s1 + $0x510] sm:$0xff] }
 0x142   :  { %2259 = vmatprep.subr.bf16.mxu1 %v2258_v51  ;;  %v2300_v28 = vpack.c.bf16 %v1422_v34, %v1421_v16  ;;  %v2334_v19 = vpack.c.bf16 %v1488_v0, %v1487_v7  ;;  %v1795_v51 = vld [vmem:[%s3652_s1 + $0x5] ss:$0 sm:$0xff]  ;;  %v1439_v21 = vld [vmem:[%s3652_s1 + $0x388] sm:$0xff]  ;;  %v1440_v23 = vld [vmem:[%s3652_s1 + $0x390] sm:$0xff] }
 0x143   :  { %v1457_v58 = vld [vmem:[%s3652_s1 + $0x418] sm:$0xff]  ;;  %v1458_v1 = vld [vmem:[%s3652_s1 + $0x420] sm:$0xff]  ;;  %v2304_v33 = vpack.c.bf16 %v1440_v23, %v1439_v21  ;;  %v1460_v46 = vld [vmem:[%s3652_s1 + $0x430] sm:$0xff] }
 0x144   :  { %2285 = vmatpush3.bf16.msra.mxu0 %v2284_v49  ;;  %v1442_v2 = vld [vmem:[%s3652_s1 + $0x3a0] sm:$0xff]  ;;  %v1443_v18 = vld [vmem:[%s3652_s1 + $0x3a8] sm:$0xff]  ;;  %v1444_v26 = vld [vmem:[%s3652_s1 + $0x3b0] sm:$0xff] }
 0x145   :  { %2261 = vmatpush3.bf16.msra.mxu1 %v2260_v15  ;;  %2287 = vmatprep.subr.bf16.mxu0 %v2286_v52  ;;  %v1461_v52 = vld [vmem:[%s3652_s1 + $0x438] sm:$0xff]  ;;  %v1462_v31 = vld [vmem:[%s3652_s1 + $0x440] sm:$0xff]  ;;  %v1463_v41 = vld [vmem:[%s3652_s1 + $0x448] sm:$0xff] }
 0x146   :  { %2263 = vmatprep.subr.bf16.mxu1 %v2262_v45  ;;  %v1445_v12 = vld [vmem:[%s3652_s1 + $0x3b8] sm:$0xff]  ;;  %v1446_v17 = vld [vmem:[%s3652_s1 + $0x3c0] sm:$0xff] }
 0x147   :  { %v2316_v47 = vpack.c.bf16 %v1446_v17, %v1445_v12  ;;  %v1465_v34 = vld [vmem:[%s3652_s1 + $0x458] sm:$0xff]  ;;  %v1476_v12 = vld [vmem:[%s3652_s1 + $0x4b0] sm:$0xff] }
 0x148   :  { %2289 = vmatpush3.bf16.msra.mxu0 %v2288_v22  ;;  %v2312_v22 = vpack.c.bf16 %v1444_v26, %v1443_v18  ;;  %v1473_v18 = vld [vmem:[%s3652_s1 + $0x498] sm:$0xff]  ;;  %v1474_v26 = vld [vmem:[%s3652_s1 + $0x4a0] sm:$0xff] }
 0x149   :  { %2265 = vmatpush3.bf16.msra.mxu1 %v2264_v24  ;;  %2291 = vmatprep.subr.bf16.mxu0 %v2290_v59  ;;  %v2306_v24 = vpack.c.bf16 %v1458_v1, %v1457_v58  ;;  %v2314_v59 = vpack.c.bf16 %v1462_v31, %v1461_v52  ;;  %v1489_v1 = vld [vmem:[%s3652_s1 + $0x518] sm:$0xff]  ;;  %v1491_v31 = vld [vmem:[%s3652_s1 + $0x528] sm:$0xff] }
 0x14a   :  { %2267 = vmatprep.subr.bf16.mxu1 %v2266_v54  ;;  %v1441_v54 = vld [vmem:[%s3652_s1 + $0x398] sm:$0xff] }
 0x14b   :  { %v2308_v37 = vpack.c.bf16 %v1442_v2, %v1441_v54 }
 0x14c   :  { %2293 = vmatpush3.bf16.msra.mxu0 %v2292_v38  ;;  %v1464_v38 = vld [vmem:[%s3652_s1 + $0x450] sm:$0xff] }
 0x14d   :  { %2269 = vmatpush3.bf16.msra.mxu1 %v2268_v9  ;;  %2295 = vmatprep.subr.bf16.mxu0 %v2294_v36  ;;  %v1459_v9 = vld [vmem:[%s3652_s1 + $0x428] sm:$0xff]  ;;  %v2318_v6 = vpack.c.bf16 %v1464_v38, %v1463_v41  ;;  %v1494_v41 = vld [vmem:[%s3652_s1 + $0x540] sm:$0xff] }
 0x14e   :  { %2303 = vmatprep.subr.bf16.mxu1 %v2302_v30  ;;  %v2310_v53 = vpack.c.bf16 %v1460_v46, %v1459_v9  ;;  %v1454_v9 = vld [vmem:[%s3652_s1 + $0x400] sm:$0xff] }
 0x150   :  { %2297 = vmatpush3.bf16.msra.mxu0 %v2296_v48  ;;  %v1447_v48 = vld [vmem:[%s3652_s1 + $0x3c8] sm:$0xff] }
 0x151   :  { %2299 = vmatprep.subr.bf16.mxu0 %v2298_v14  ;;  %v1448_v14 = vld [vmem:[%s3652_s1 + $0x3d0] sm:$0xff] }
 0x154   :  { %2301 = vmatpush3.bf16.msra.mxu0 %v2300_v28  ;;  %v1466_v28 = vld [vmem:[%s3652_s1 + $0x460] sm:$0xff] }
 0x155   :  { %2335 = vmatprep.subr.bf16.mxu0 %v2334_v19  ;;  %v2320_v19 = vpack.c.bf16 %v1448_v14, %v1447_v48  ;;  %v1477_v48 = vld [vmem:[%s3652_s1 + $0x4b8] sm:$0xff]  ;;  %v1478_v14 = vld [vmem:[%s3652_s1 + $0x4c0] sm:$0xff] }
 0x187   :  { %v1191_v29 = vpop.xlane.xlu1 %1190 }
 0x188   :  { %v1202_v63 = vadd.f32 %v1795_v51, %v1191_v29  ;;  %v1449_v29 = vld [vmem:[%s3652_s1 + $0x3d8] sm:$0xff] }
 0x195   :  { %v1189_v5 = vpop.xlane.xlu0 %1188 }
 0x196   :  { %v1201_v50 = vadd.f32 %v1795_v51, %v1189_v5  ;;  %v1450_v5 = vld [vmem:[%s3652_s1 + $0x3e0] sm:$0xff] }
 0x1ad   :  { %v1193_v20 = vpop.xlane.xlu1 %1192 }
 0x1ae   :  { %v1203_v25 = vadd.f32 %v1795_v51, %v1193_v20 }
 0x1b0   :  { %v1195_v40 = vpop.xlane.xlu0 %1194 }
 0x1b1   :  { %v1204_v11 = vadd.f32 %v1795_v51, %v1195_v40  ;;  %v2322_v51 = vpack.c.bf16 %v1466_v28, %v1465_v34 }
 0x1da   :  { %v2100_v43 = vpop.f32.mrb[0].mxu1 }
 0x1db   :  { %v1206_v13 = vmul.f32 2.0, %v2100_v43  ;;  %v1165_v4 = vpop.f32.mrb[1].mxu1  ;;  %v1467_v43 = vld [vmem:[%s3652_s1 + $0x468] sm:$0xff] }
 0x1dc   :  { %v1205_v32 = vmul.f32 2.0, %v1165_v4  ;;  %v3531_v4 = vld [vmem:[%s3652_s1 + $0x6] ss:$0 sm:$0xff] }
 0x1dd   :  { %v1210_v55 = vsub.f32 %v1202_v63, %v1206_v13  ;;  %v1468_v63 = vld [vmem:[%s3652_s1 + $0x470] sm:$0xff]  ;;  %v2324_v13 = vpack.c.bf16 %v1450_v5, %v1449_v29  ;;  %v2348_v5 = vpack.c.bf16 %v1478_v14, %v1477_v48 }
 0x1de   :  { %v1209_v15 = vsub.f32 %v1201_v50, %v1205_v32  ;;  %v1337_v50 = vpop.xlane.xlu0 %1336  ;;  %v2326_v32 = vpack.c.bf16 %v1468_v63, %v1467_v43 }
 0x1df   :  { %v1214_v8 = vmax.f32 %v1210_v55, 0.0  ;;  %v1451_v55 = vld [vmem:[%s3652_s1 + $0x3e8] sm:$0xff]  ;;  %v1348_v21 = vadd.f32 %v3531_v4, %v1337_v50  ;;  %v1480_v50 = vld [vmem:[%s3652_s1 + $0x4d0] sm:$0xff] }
 0x1e0   :  { %v1213_v27 = vmax.f32 %v1209_v15, 0.0  ;;  %v1452_v15 = vld [vmem:[%s3652_s1 + $0x3f0] sm:$0xff] }
 0x1e1   :  { %v1218_v44 = vmul.f32 -0.5, %v1214_v8  ;;  %v1335_v8 = vpop.xlane.xlu1 %1334 }
 0x1e2   :  { %v1217_v45 = vmul.f32 -0.5, %v1213_v27  ;;  %v1469_v27 = vld [vmem:[%s3652_s1 + $0x478] sm:$0xff]  ;;  %v1341_v38 = vpop.xlane.xlu0 %1340 }
 0x1e3   :  { %v1223_v42 = vmul.f32 1.442695, %v1218_v44  ;;  %v1470_v44 = vld [vmem:[%s3652_s1 + $0x480] sm:$0xff] }
 0x1e4   :  { %v1221_v56 = vmul.f32 1.442695, %v1217_v45  ;;  %v2330_v2 = vpack.c.bf16 %v1470_v44, %v1469_v27 }
 0x1e5   :  { %2454 = vpow2.f32 %v1223_v42  ;;  %v1471_v42 = vld [vmem:[%s3652_s1 + $0x488] sm:$0xff] }
 0x1e6   :  { %2456 = vpow2.f32 %v1221_v56  ;;  %v1472_v56 = vld [vmem:[%s3652_s1 + $0x490] sm:$0xff] }
 0x1e7   :  { %v2336_v40 = vpack.c.bf16 %v1472_v56, %v1471_v42  ;;  %v1481_v42 = vld [vmem:[%s3652_s1 + $0x4d8] sm:$0xff]  ;;  %v1482_v56 = vld [vmem:[%s3652_s1 + $0x4e0] sm:$0xff] }
 0x1ef   :  { %v2455_v57 = vpop.eup %2454 }
 0x1f0   :  { %v2457_v60 = vpop.eup %2456  ;;  %1572 = vmatprep.mubr.f32.mxu1 %v2455_v57  ;;  %v2328_v57 = vpack.c.bf16 %v1452_v15, %v1451_v55  ;;  %v1498_v55 = vld [vmem:[%s3652_s1 + $0x560] sm:$0xff] }
 0x1f1   :  { %1573 = vmatmul.mubr.f32.vlgmr.msra.gmra.mrb[4].mxu1 %v2457_v60  ;;  %v1453_v60 = vld [vmem:[%s3652_s1 + $0x3f8] sm:$0xff] }
 0x1f2   :  { %2305 = vmatpush3.bf16.msra.mxu1 %v2304_v33  ;;  %v1490_v33 = vld [vmem:[%s3652_s1 + $0x520] sm:$0xff] }
 0x1f3   :  { %2307 = vmatprep.subr.bf16.mxu1 %v2306_v24  ;;  %v1347_v24 = vadd.f32 %v3531_v4, %v1335_v8 }
 0x1f4   :  { %v2103_v49 = vpop.f32.mrb[2].mxu1 }
 0x1f5   :  { %v1208_v39 = vmul.f32 2.0, %v2103_v49  ;;  %v1175_v61 = vpop.f32.mrb[3].mxu1 }
 0x1f6   :  { %v1207_v10 = vmul.f32 2.0, %v1175_v61  ;;  %2309 = vmatpush3.bf16.msra.mxu1 %v2308_v37 }
 0x1f7   :  { %v1212_v30 = vsub.f32 %v1204_v11, %v1208_v39  ;;  %2311 = vmatprep.subr.bf16.mxu1 %v2310_v53  ;;  %v2338_v53 = vpack.c.bf16 %v1490_v33, %v1489_v1  ;;  %v1492_v11 = vld [vmem:[%s3652_s1 + $0x530] sm:$0xff]  ;;  %v2332_v39 = vpack.c.bf16 %v1454_v9, %v1453_v60  ;;  %v1501_v9 = vld [vmem:[%s3652_s1 + $0x578] sm:$0xff] }
 0x1f8   :  { %v1211_v35 = vsub.f32 %v1203_v25, %v1207_v10  ;;  %v2340_v10 = vpack.c.bf16 %v1474_v26, %v1473_v18  ;;  %v1500_v1 = vld [vmem:[%s3652_s1 + $0x570] sm:$0xff] }
 0x1f9   :  { %v1216_v36 = vmax.f32 %v1212_v30, 0.0  ;;  %v2342_v30 = vpack.c.bf16 %v1492_v11, %v1491_v31  ;;  %v1484_v60 = vld [vmem:[%s3652_s1 + $0x4f0] sm:$0xff] }
 0x1fa   :  { %v1215_v62 = vmax.f32 %v1211_v35, 0.0  ;;  %2313 = vmatpush3.bf16.msra.mxu1 %v2312_v22  ;;  %v1493_v35 = vld [vmem:[%s3652_s1 + $0x538] sm:$0xff] }
 0x1fb   :  { %v1220_v3 = vmul.f32 -0.5, %v1216_v36  ;;  %2315 = vmatprep.subr.bf16.mxu1 %v2314_v59  ;;  %v1475_v59 = vld [vmem:[%s3652_s1 + $0x4a8] sm:$0xff] }
 0x1fc   :  { %v1219_v16 = vmul.f32 -0.5, %v1215_v62  ;;  %v1339_v62 = vpop.xlane.xlu1 %1338 }
 0x1fd   :  { %v1227_v7 = vmul.f32 1.442695, %v1220_v3 }
 0x1fe   :  { %v1225_v0 = vmul.f32 1.442695, %v1219_v16  ;;  %2317 = vmatpush3.bf16.msra.mxu1 %v2316_v47  ;;  %v2344_v47 = vpack.c.bf16 %v1476_v12, %v1475_v59  ;;  %v1350_v16 = vadd.f32 %v3531_v4, %v1341_v38 }
 0x1ff   :  { %2458 = vpow2.f32 %v1227_v7  ;;  %2319 = vmatprep.subr.bf16.mxu1 %v2318_v6  ;;  %v2346_v6 = vpack.c.bf16 %v1494_v41, %v1493_v35  ;;  %v1495_v7 = vld [vmem:[%s3652_s1 + $0x548] sm:$0xff] }
 0x200   :  { %2460 = vpow2.f32 %v1225_v0  ;;  %v1496_v0 = vld [vmem:[%s3652_s1 + $0x550] sm:$0xff] }
 0x201   :  { %v2350_v63 = vpack.c.bf16 %v1496_v0, %v1495_v7 }
 0x202   :  { %2321 = vmatpush3.bf16.msra.mxu1 %v2320_v19  ;;  %v1349_v19 = vadd.f32 %v3531_v4, %v1339_v62  ;;  %v1497_v4 = vld [vmem:[%s3652_s1 + $0x558] sm:$0xff] }
 0x203   :  { %2323 = vmatprep.subr.bf16.mxu1 %v2322_v51 }
 0x205   :  { %v2138_v45 = vpop.f32.mrb[16].mxu0 }
 0x206   :  { %v1352_v23 = vmul.f32 2.0, %v2138_v45  ;;  %v1311_v58 = vpop.f32.mrb[17].mxu0  ;;  %2325 = vmatpush3.bf16.msra.mxu1 %v2324_v13  ;;  %v1479_v13 = vld [vmem:[%s3652_s1 + $0x4c8] sm:$0xff]  ;;  %v2354_v45 = vpack.c.bf16 %v1498_v55, %v1497_v4 }
 0x207   :  { %v1351_v54 = vmul.f32 2.0, %v1311_v58  ;;  %2327 = vmatprep.subr.bf16.mxu1 %v2326_v32  ;;  %v2352_v27 = vpack.c.bf16 %v1480_v50, %v1479_v13  ;;  %v1499_v58 = vld [vmem:[%s3652_s1 + $0x568] sm:$0xff] }
 0x208   :  { %v1356_v46 = vsub.f32 %v1348_v21, %v1352_v23 }
 0x209   :  { %v2459_v37 = vpop.eup %2458  ;;  %v1355_v20 = vsub.f32 %v1347_v24, %v1351_v54  ;;  %v2356_v24 = vpack.c.bf16 %v1482_v56, %v1481_v42  ;;  %v2358_v54 = vpack.c.bf16 %v1500_v1, %v1499_v58 }
 0x20a   :  { %v2461_v49 = vpop.eup %2460  ;;  %v1360_v52 = vmax.f32 %v1356_v46, 0.0  ;;  %1642 = vmatprep.mubr.f32.mxu0 %v2459_v37  ;;  %2329 = vmatpush3.bf16.msra.mxu1 %v2328_v57  ;;  %v1502_v46 = vld [vmem:[%s3652_s1 + $0x580] sm:$0xff] }
 0x20b   :  { %v1359_v61 = vmax.f32 %v1355_v20, 0.0  ;;  %1643 = vmatmul.mubr.f32.vlgmr.msra.gmra.mrb[20].mxu0 %v2461_v49  ;;  %2331 = vmatprep.subr.bf16.mxu1 %v2330_v2  ;;  %v1483_v2 = vld [vmem:[%s3652_s1 + $0x4e8] sm:$0xff]  ;;  %v2362_v37 = vpack.c.bf16 %v1502_v46, %v1501_v9  ;;  %v1485_v20 = vld [vmem:[%s3652_s1 + $0x4f8] sm:$0xff] }
 0x20c   :  { %v1364_v25 = vmul.f32 -0.3472222, %v1360_v52  ;;  %2337 = vmatpush3.bf16.msra.mxu0 %v2336_v40  ;;  %v2360_v40 = vpack.c.bf16 %v1484_v60, %v1483_v2 }
 0x20d   :  { %v1363_v22 = vmul.f32 -0.3472222, %v1359_v61  ;;  %2339 = vmatprep.subr.bf16.mxu0 %v2338_v53  ;;  %v1486_v53 = vld [vmem:[%s3652_s1 + $0x500] sm:$0xff] }
 0x20e   :  { %v1369_v17 = vmul.f32 1.442695, %v1364_v25  ;;  %2333 = vmatpush3.bf16.msra.mxu1 %v2332_v39  ;;  %v2364_v18 = vpack.c.bf16 %v1486_v53, %v1485_v20  ;;  %v1797_v39 = vld [vmem:[%s3652_s1 + $0x7] ss:$0 sm:$0xff] }
 0x20f   :  { %v1367_v36 = vmul.f32 1.442695, %v1363_v22 }
 0x210   :  { %2462 = vpow2.f32 %v1369_v17  ;;  %2341 = vmatpush3.bf16.msra.mxu0 %v2340_v10 }
 0x211   :  { %2464 = vpow2.f32 %v1367_v36  ;;  %2343 = vmatprep.subr.bf16.mxu0 %v2342_v30  ;;  %v2141_v3 = vpop.f32.mrb[18].mxu0 }
 0x212   :  { %v1354_v34 = vmul.f32 2.0, %v2141_v3  ;;  %v1321_v28 = vpop.f32.mrb[19].mxu0 }
 0x213   :  { %v1353_v51 = vmul.f32 2.0, %v1321_v28 }
 0x214   :  { %v1358_v29 = vsub.f32 %v1350_v16, %v1354_v34  ;;  %2345 = vmatpush3.bf16.msra.mxu0 %v2344_v47 }
 0x215   :  { %v1357_v43 = vsub.f32 %v1349_v19, %v1353_v51  ;;  %2347 = vmatprep.subr.bf16.mxu0 %v2346_v6 }
 0x216   :  { %v1362_v32 = vmax.f32 %v1358_v29, 0.0 }
 0x217   :  { %v1361_v15 = vmax.f32 %v1357_v43, 0.0 }
 0x218   :  { %v1366_v8 = vmul.f32 -0.3472222, %v1362_v32  ;;  %2349 = vmatpush3.bf16.msra.mxu0 %v2348_v5 }
 0x219   :  { %v1365_v44 = vmul.f32 -0.3472222, %v1361_v15  ;;  %2351 = vmatprep.subr.bf16.mxu0 %v2350_v63 }
 0x21a   :  { %v2463_v21 = vpop.eup %2462  ;;  %v1373_v23 = vmul.f32 1.442695, %v1366_v8 }
 0x21b   :  { %v2465_v33 = vpop.eup %2464  ;;  %v1371_v57 = vmul.f32 1.442695, %v1365_v44  ;;  %1712 = vmatprep.mubr.f32.mxu1 %v2463_v21 }
 0x21c   :  { %2466 = vpow2.f32 %v1373_v23  ;;  %2353 = vmatpush3.bf16.msra.mxu0 %v2352_v27  ;;  %1713 = vmatmul.mubr.f32.vlgmr.msra.gmra.mrb[6].mxu1 %v2465_v33 }
 0x21d   :  { %2355 = vmatprep.subr.bf16.mxu0 %v2354_v45  ;;  %2468 = vpow2.f32 %v1371_v57 }
 0x220   :  { %2357 = vmatpush3.bf16.msra.mxu0 %v2356_v24 }
 0x221   :  { %2359 = vmatprep.subr.bf16.mxu0 %v2358_v54 }
 0x224   :  { %2361 = vmatpush3.bf16.msra.mxu0 %v2360_v40 }
 0x225   :  { %2363 = vmatprep.subr.bf16.mxu0 %v2362_v37 }
 0x226   :  { %v2467_v26 = vpop.eup %2466 }
 0x227   :  { %1782 = vmatprep.mubr.f32.mxu0 %v2467_v26  ;;  %v2469_v49 = vpop.eup %2468 }
 0x228   :  { %2365 = vmatpush3.bf16.msra.mxu0 %v2364_v18 }
 0x22b   :  { %1783 = vmatmul.mubr.f32.vlgmr.msra.gmra.mrb[22].mxu0 %v2469_v49 }
 0x2c4   :  { %v1902_v52 = vpop.f32.mrb[4].mxu1 }
 0x2c5   :  { %v1903_v31 = vpop.f32.mrb[5].mxu1 }
 0x2c6   :  { %v1904_v11 = vadd.f32 %v1903_v31, %v1902_v52 }
 0x2c8   :  { %v1575_v10 = vadd.f32 %v1904_v11, %v1797_v39 }
 0x2de   :  { %v1937_v61 = vpop.f32.mrb[20].mxu0 }
 0x2df   :  { %v1938_v25 = vpop.f32.mrb[21].mxu0 }
 0x2e0   :  { %v1939_v22 = vadd.f32 %v1938_v25, %v1937_v61 }
 0x2e2   :  { %v1645_v30 = vadd.f32 %v1939_v22, %v1575_v10 }
 0x2ef   :  { %v1972_v59 = vpop.f32.mrb[6].mxu1 }
 0x2f0   :  { %v1973_v12 = vpop.f32.mrb[7].mxu1 }
 0x2f1   :  { %v1974_v17 = vadd.f32 %v1973_v12, %v1972_v59 }
 0x2f3   :  { %v1715_v35 = vadd.f32 %v1974_v17, %v1645_v30 }
 0x2fe   :  { %v2007_v41 = vpop.f32.mrb[22].mxu0 }
 0x2ff   :  { %v2008_v38 = vpop.f32.mrb[23].mxu0 }
 0x300   :  { %v2009_v36 = vadd.f32 %v2008_v38, %v2007_v41 }
 0x302   :  { %v1785_v62 = vadd.f32 %v2009_v36, %v1715_v35 }
 0x304   :  { %1788 = vst [vmem:[%s3653_s2] sm:$0xff] %v1785_v62 }

</bundles_post_ra>
